<compile_context>
chip_gen: v7x
topology: tpu7x:2x2x1
jax: 0.10.0
libtpu: 0.0.40
codegen_flags: <defaults>
</compile_context>

<pallas_src>
import math
import functools

import jax
import jax.numpy as jnp
from jax.experimental import pallas as pl
from jax.experimental.pallas import tpu as pltpu


# --------------------------------------------------------------------------- #
# Pass 1: fused QKV projection + non-interleaved rotary on Q and K.
# --------------------------------------------------------------------------- #

def _qkv_rope_kernel(x_ref, wqkv_ref, cos_ref, sin_ref, q_ref, k_ref, v_ref,
                     *, nhead, head_dim, d_model):
    half = head_dim // 2
    x = x_ref[...].astype(jnp.bfloat16)                                   # (tp, D)
    qkv = jnp.dot(x, wqkv_ref[...], preferred_element_type=jnp.float32)   # (tp, 3D)
    cos = cos_ref[...]                                                     # (tp, hd)
    sin = sin_ref[...]                                                     # (tp, hd) sign-folded

    # TODO(synk): exact `apply_rotary_embedding_not_flash_x` source unavailable;
    #             standard non-interleaved rotary over the full head_dim is used.
    for h in range(nhead):
        lo = h * head_dim
        qh = qkv[:, lo:lo + head_dim]
        kh = qkv[:, d_model + lo:d_model + lo + head_dim]
        q_ref[:, lo:lo + head_dim] = (
            qh * cos + pltpu.roll(qh, half, axis=1) * sin).astype(q_ref.dtype)
        k_ref[:, lo:lo + head_dim] = (
            kh * cos + pltpu.roll(kh, half, axis=1) * sin).astype(k_ref.dtype)
    v_ref[...] = qkv[:, 2 * d_model:].astype(v_ref.dtype)


# --------------------------------------------------------------------------- #
# Pass 2: sliding-window flash attention + out_proj + deepnorm/RMSNorm + SwiGLU.
# --------------------------------------------------------------------------- #

def _attn_ffn_kernel(xq_ref, q_ref, k_ref, v_ref, wout_ref, bout_ref,
                     w1_ref, w2_ref, g1_ref, g2_ref, o_ref,
                     acc_ref, m_ref, l_ref,
                     *, nhead, head_dim, d_hidden, seq_len,
                     tq, tk, wl, wr, n_kv, alpha, eps):
    qi = pl.program_id(1)
    kv = pl.program_id(2)
    q_start = qi * tq
    kt_max = seq_len // tk - 1
    scale = 1.0 / math.sqrt(head_dim)
    bf16 = jnp.bfloat16

    @pl.when(kv == 0)
    def _():
        m_ref[...] = jnp.full(m_ref.shape, -jnp.inf, jnp.float32)
        l_ref[...] = jnp.zeros(l_ref.shape, jnp.float32)
        acc_ref[...] = jnp.zeros(acc_ref.shape, jnp.float32)

    # Recompute which kv block the BlockSpec fetched (same formula as index_map),
    # and skip the window-padding steps entirely (no double counting).
    kt_lo = jnp.maximum(q_start - wl, 0) // tk
    kt_hi = jnp.minimum(q_start + tq - 1 + wr, seq_len - 1) // tk
    kt = jnp.minimum(kt_lo + kv, kt_max)
    is_real = (kt_lo + kv) <= kt_hi

    @pl.when(is_real)
    def _():
        kv_start = kt * tk
        row_ids = q_start + jax.lax.broadcasted_iota(jnp.int32, (tq, tk), 0)
        col_ids = kv_start + jax.lax.broadcasted_iota(jnp.int32, (tq, tk), 1)
        rel = col_ids - row_ids
        allowed = (rel >= -wl) & (rel <= wr)

        for h in range(nhead):                       # static unroll; lane-aligned slices
            lo = h * head_dim
            qh = q_ref[:, lo:lo + head_dim]          # (tq, hd) bf16
            kh = k_ref[:, lo:lo + head_dim]          # (tk, hd) bf16
            vh = v_ref[:, lo:lo + head_dim]          # (tk, hd) bf16
            s = jax.lax.dot_general(
                qh, kh, (((1,), (1,)), ((), ())),
                preferred_element_type=jnp.float32) * scale          # (tq, tk)
            # finite "-inf" so fully-masked rows never produce NaNs
            s = jnp.where(allowed, s, -1e30)

            m_prev = m_ref[h]                                         # (tq, 1)
            m_new = jnp.maximum(m_prev, jnp.max(s, axis=-1, keepdims=True))
            corr = jnp.exp(m_prev - m_new)
            p = jnp.exp(s - m_new)
            l_ref[h] = corr * l_ref[h] + jnp.sum(p, axis=-1, keepdims=True)
            acc_ref[:, lo:lo + head_dim] = (
                corr * acc_ref[:, lo:lo + head_dim]
                + jnp.dot(p.astype(bf16), vh, preferred_element_type=jnp.float32))
            m_ref[h] = m_new

    @pl.when(kv == n_kv - 1)
    def _():
        # ---- normalize attention output per head ----
        inv = pl.reciprocal(jnp.maximum(l_ref[...], 1e-30), approx=True)  # (nh,tq,1)
        ctx = jnp.concatenate(
            [acc_ref[:, h * head_dim:(h + 1) * head_dim] * inv[h]
             for h in range(nhead)], axis=-1)                             # (tq, D) f32

        # ---- output projection (with bias) ----
        out = jnp.dot(ctx.astype(bf16), wout_ref[...],
                      preferred_element_type=jnp.float32) + bout_ref[...]

        # ---- deepnorm residual 1 + RMSNorm1 ----
        x_q = xq_ref[...].astype(jnp.float32)
        x1 = out + alpha * x_q
        x2 = x1 * jax.lax.rsqrt(jnp.mean(x1 * x1, axis=-1, keepdims=True) + eps) * g1_ref[...]

        # ---- GatedMlp (SwiGLU), no biases ----
        y = jnp.dot(x2.astype(bf16), w1_ref[...], preferred_element_type=jnp.float32)
        yv = y[:, :d_hidden]
        gate = y[:, d_hidden:]
        hidden = yv * (gate * jax.nn.sigmoid(gate))
        x3 = jnp.dot(hidden.astype(bf16), w2_ref[...], preferred_element_type=jnp.float32)

        # ---- deepnorm residual 2 + RMSNorm2 ----
        x3 = x3 + alpha * x2
        x4 = x3 * jax.lax.rsqrt(jnp.mean(x3 * x3, axis=-1, keepdims=True) + eps) * g2_ref[...]
        o_ref[...] = x4.astype(o_ref.dtype)


# ------------------------------- host-side glue ----------------------------- #

def rotary_tables(seq_len, dim, base=10000.0):
    """Full-head-dim cos table and sign-folded sin table for the roll-based rope."""
    inv_freq = 1.0 / (base ** (jnp.arange(0, dim, 2, dtype=jnp.float32) / dim))
    t = jnp.arange(seq_len, dtype=jnp.float32)
    freqs = jnp.outer(t, inv_freq)                              # (T, dim//2)
    cos = jnp.cos(freqs)
    sin = jnp.sin(freqs)
    return (jnp.concatenate([cos, cos], axis=-1),               # (T, dim)
            jnp.concatenate([-sin, sin], axis=-1))              # (T, dim) sign-folded


def _vmem_limit_bytes():
    """Generation-aware VMEM budget (~3/4 of physical, with a safe fallback)."""
    try:
        cap = int(pltpu.get_tpu_info().vmem_capacity_bytes)
    except Exception:
        cap = 64 * 1024 * 1024
    return int(min(cap * 3 // 4, 112 * 1024 * 1024))


def transformer_encoder_layer(x, params, attn_window, deepnorm_alpha, eps=1e-5,
                              block_q=128, block_k=128):
    N, T, D = x.shape
    nhead = params["nhead"]
    head_dim = D // nhead
    d_hidden = params["w2"].shape[0]
    wl, wr = int(attn_window[0]), int(attn_window[1])

    tq = min(block_q, T)
    tk = min(block_k, T)
    assert T % tq == 0 and T % tk == 0, "seq_len must divide the tile sizes"
    assert D % 128 == 0, "d_model should be lane-aligned for dense stores"
    assert head_dim % 2 == 0

    cos_full, sin_signed = rotary_tables(T, head_dim)
    vmem_limit = _vmem_limit_bytes()
    bf16 = jnp.bfloat16
    vmem_spec = pl.BlockSpec(memory_space=pltpu.MemorySpace.VMEM)

    # -------- pass 1: QKV projection + rotary (once per token) -------- #
    qkv_kernel = functools.partial(
        _qkv_rope_kernel, nhead=nhead, head_dim=head_dim, d_model=D)
    q, k, v = pl.pallas_call(
        qkv_kernel,
        out_shape=tuple(jax.ShapeDtypeStruct((N, T, D), bf16) for _ in range(3)),
        grid_spec=pltpu.PrefetchScalarGridSpec(
            num_scalar_prefetch=0,
            grid=(N, T // tq),
            in_specs=[
                pl.BlockSpec((None, tq, D), lambda b, i: (b, i, 0)),   # x tile
                vmem_spec,                                             # Wqkv (D,3D) bf16
                pl.BlockSpec((tq, head_dim), lambda b, i: (i, 0)),     # cos
                pl.BlockSpec((tq, head_dim), lambda b, i: (i, 0)),     # sin (sign-folded)
            ],
            out_specs=tuple(pl.BlockSpec((None, tq, D), lambda b, i: (b, i, 0))
                            for _ in range(3)),
        ),
        compiler_params=pltpu.CompilerParams(
            dimension_semantics=("parallel", "parallel"),
            vmem_limit_bytes=vmem_limit),
    )(x, params["wqkv"], cos_full, sin_signed)

    # -------- static kv-tile schedule for the sliding window -------- #
    n_qt = T // tq
    kt_max = T // tk - 1

    def _lo(q0):
        return max(q0 - wl, 0) // tk

    def _hi(q0):
        return min(q0 + tq - 1 + wr, T - 1) // tk

    n_kv = max(1, max((_hi(i * tq) - _lo(i * tq) + 1) for i in range(n_qt)))

    def kv_index(b, qi, kvi):
        kt_lo = jnp.maximum(qi * tq - wl, 0) // tk
        return (b, jnp.minimum(kt_lo + kvi, kt_max), 0)

    attn_kernel = functools.partial(
        _attn_ffn_kernel,
        nhead=nhead, head_dim=head_dim, d_hidden=d_hidden, seq_len=T,
        tq=tq, tk=tk, wl=wl, wr=wr, n_kv=n_kv,
        alpha=float(deepnorm_alpha), eps=float(eps))

    # advisory cost estimate
    w_eff = min(T, max(wl, 0) + max(wr, 0) + 1)
    flops = int(N * T * (2 * D * D + 4 * w_eff * D + 6 * D * d_hidden))
    transcendentals = int(N * T * (nhead * w_eff + d_hidden + 2))
    bytes_accessed = int(N * T * D * (4 + 3 * 2 + 4)
                         + (D * D + 2 * D * d_hidden) * 2 + 4 * D * 4)

    return pl.pallas_call(
        attn_kernel,
        out_shape=jax.ShapeDtypeStruct((N, T, D), x.dtype),
        grid_spec=pltpu.PrefetchScalarGridSpec(
            num_scalar_prefetch=0,
            grid=(N, n_qt, n_kv),
            in_specs=[
                pl.BlockSpec((None, tq, D), lambda b, qi, kvi: (b, qi, 0)),  # x (residual)
                pl.BlockSpec((None, tq, D), lambda b, qi, kvi: (b, qi, 0)),  # q (roped, bf16)
                pl.BlockSpec((None, tk, D), kv_index),                       # k block (bf16)
                pl.BlockSpec((None, tk, D), kv_index),                       # v block (bf16)
                vmem_spec,   # wout
                vmem_spec,   # bout
                vmem_spec,   # w1
                vmem_spec,   # w2
                vmem_spec,   # g1
                vmem_spec,   # g2
            ],
            out_specs=pl.BlockSpec((None, tq, D), lambda b, qi, kvi: (b, qi, 0)),
            scratch_shapes=[
                pltpu.VMEM((tq, D), jnp.float32),           # attention accumulator
                pltpu.VMEM((nhead, tq, 1), jnp.float32),    # running max
                pltpu.VMEM((nhead, tq, 1), jnp.float32),    # running denom
            ],
        ),
        compiler_params=pltpu.CompilerParams(
            dimension_semantics=("parallel", "parallel", "arbitrary"),
            vmem_limit_bytes=vmem_limit),
        cost_estimate=pl.CostEstimate(flops=flops,
                                      transcendentals=transcendentals,
                                      bytes_accessed=bytes_accessed),
    )(x, q, k, v, params["wout"], params["bout"], params["w1"], params["w2"],
      params["g1"], params["g2"])


# ---------------------- deterministic parameter init ------------------------ #

def init_params(key, d_model, nhead, dim_feedforward, deepnorm_beta):
    def xavier_normal(k, out_f, in_f, gain):
        std = gain * math.sqrt(2.0 / (in_f + out_f))
        return std * jax.random.normal(k, (out_f, in_f), jnp.float32)

    keys = jax.random.split(key, 6)
    # Wqkv (3D, D): q,k slices gain 1; v slice gain beta (matches reset_parameters).
    wqk = xavier_normal(keys[0], 2 * d_model, d_model, 1.0)
    wv = xavier_normal(keys[1], d_model, d_model, deepnorm_beta)
    wqkv = jnp.concatenate([wqk, wv], axis=0)                    # (3D, D) torch layout
    wout = xavier_normal(keys[2], d_model, d_model, deepnorm_beta)
    bout = 0.01 * jax.random.normal(keys[3], (d_model,), jnp.float32)
    w1 = xavier_normal(keys[4], 2 * dim_feedforward, d_model, deepnorm_beta)
    w2 = xavier_normal(keys[5], d_model, dim_feedforward, deepnorm_beta)

    bf = jnp.bfloat16
    return {
        "wqkv": wqkv.T.astype(bf),                     # (D, 3D)
        "wout": wout.T.astype(bf),                     # (D, D)
        "bout": bout.reshape(1, d_model),              # f32
        "w1": w1.T.astype(bf),                         # (D, 2H)
        "w2": w2.T.astype(bf),                         # (H, D)
        "g1": jnp.ones((1, d_model), jnp.float32),     # RMSNorm1 weight
        "g2": jnp.ones((1, d_model), jnp.float32),     # RMSNorm2 weight
        "nhead": nhead,
    }


# ---------------------------- plain-JAX reference --------------------------- #

def reference(x, params, cos_full, sin_signed, attn_window, alpha, eps):
    N, T, D = x.shape
    nhead = params["nhead"]
    hd = D // nhead
    H = params["w2"].shape[0]
    wl, wr = int(attn_window[0]), int(attn_window[1])
    scale = 1.0 / math.sqrt(hd)

    def bmm(a, b):   # mirror the kernel's bf16 matmul / f32 accumulation
        return jnp.dot(a.astype(jnp.bfloat16), b.astype(jnp.bfloat16),
                       preferred_element_type=jnp.float32)

    wqkv = params["wqkv"]
    q = bmm(x, wqkv[:, :D]).reshape(N, T, nhead, hd)
    k = bmm(x, wqkv[:, D:2 * D]).reshape(N, T, nhead, hd)
    v = bmm(x, wqkv[:, 2 * D:]).reshape(N, T, nhead, hd)

    def rope(t):
        c = cos_full[None, :, None, :]
        s = sin_signed[None, :, None, :]
        rot = jnp.concatenate([t[..., hd // 2:], t[..., :hd // 2]], axis=-1)
        return t * c + rot * s

    q, k = rope(q), rope(k)
    q, k, v = (jnp.transpose(a, (0, 2, 1, 3)) for a in (q, k, v))     # (N, nh, T, hd)

    s = jnp.einsum("nhqd,nhkd->nhqk", q.astype(jnp.bfloat16), k.astype(jnp.bfloat16),
                   preferred_element_type=jnp.float32) * scale
    i = jnp.arange(T)[:, None]
    j = jnp.arange(T)[None, :]
    allowed = ((j - i) >= -wl) & ((j - i) <= wr)
    s = jnp.where(allowed[None, None], s, -1e30)
    p = jax.nn.softmax(s, axis=-1)
    o = jnp.einsum("nhqk,nhkd->nhqd", p.astype(jnp.bfloat16), v.astype(jnp.bfloat16),
                   preferred_element_type=jnp.float32)
    o = jnp.transpose(o, (0, 2, 1, 3)).reshape(N, T, D)

    out = bmm(o, params["wout"]) + params["bout"]
    x1 = out + alpha * x
    x2 = x1 * jax.lax.rsqrt(jnp.mean(x1 * x1, -1, keepdims=True) + eps) * params["g1"]
    y = bmm(x2, params["w1"])
    yv, gate = y[..., :H], y[..., H:]
    x3 = bmm(yv * (gate * jax.nn.sigmoid(gate)), params["w2"])
    x3 = x3 + alpha * x2
    x4 = x3 * jax.lax.rsqrt(jnp.mean(x3 * x3, -1, keepdims=True) + eps) * params["g2"]
    return x4


# ----------------------------------- main ----------------------------------- #

if __name__ == "__main__":
    N, T = 2, 192
    d_model, nhead, dim_feedforward = 256, 2, 256      # head_dim = 128 (lane-aligned)
    deepnorm_alpha, deepnorm_beta = 1.2968, 0.5
    attn_window = (24, 16)   # NOTE: the module default (-1, -1) masks everything (degenerate)
    eps = 1e-5

    key = jax.random.PRNGKey(0)
    kx, kp = jax.random.split(key)
    x = jax.random.normal(kx, (N, T, d_model), jnp.float32)
    params = init_params(kp, d_model, nhead, dim_feedforward, deepnorm_beta)

    # block_q/block_k chosen so the kv grid axis (incl. padding-step skip) is exercised
    out = transformer_encoder_layer(x, params, attn_window, deepnorm_alpha, eps,
                                    block_q=64, block_k=64)
    out = jax.block_until_ready(out)

    # correctness check vs. plain-JAX reference (same bf16 matmul precision)
    cos_full, sin_signed = rotary_tables(T, d_model // nhead)
    ref = reference(x, params, cos_full, sin_signed, attn_window, deepnorm_alpha, eps)
    err = float(jnp.max(jnp.abs(out - ref)))
    assert err < 5e-2, f"mismatch vs reference: {err}"

    print("KERNEL_OK")
</pallas_src>

<mosaic_0001>
module attributes {stable_mosaic.version = 11 : i64} {
  func.func @_qkv_rope_kernel(%arg0: i32, %arg1: i32, %arg2: memref<1x64x256xf32, #tpu.memory_space<vmem>>, %arg3: memref<256x768xbf16, #tpu.memory_space<vmem>>, %arg4: memref<64x128xf32, #tpu.memory_space<vmem>>, %arg5: memref<64x128xf32, #tpu.memory_space<vmem>>, %arg6: memref<1x64x256xbf16, #tpu.memory_space<vmem>>, %arg7: memref<1x64x256xbf16, #tpu.memory_space<vmem>>, %arg8: memref<1x64x256xbf16, #tpu.memory_space<vmem>>) attributes {dimension_semantics = [#tpu.dimension_semantics<parallel>, #tpu.dimension_semantics<parallel>], iteration_bounds = array<i64: 2, 3>, scalar_prefetch = 0 : i64, scratch_operands = 0 : i64, tpu.core_type = #tpu.core_type<tc>, window_params = [{transform_indices = @transform_0, window_bounds = array<i64: 1, 64, 256>}, {pipeline_mode = #tpu.pipeline_mode<synchronous>, transform_indices = @transform_1, window_bounds = array<i64: 256, 768>}, {transform_indices = @transform_2, window_bounds = array<i64: 64, 128>}, {transform_indices = @transform_3, window_bounds = array<i64: 64, 128>}, {transform_indices = @transform_4, window_bounds = array<i64: 1, 64, 256>}, {transform_indices = @transform_5, window_bounds = array<i64: 1, 64, 256>}, {transform_indices = @transform_6, window_bounds = array<i64: 1, 64, 256>}]} {
    %c0 = arith.constant 0 : index
    %c0_0 = arith.constant 0 : index
    %c0_1 = arith.constant 0 : index
    %0 = vector.load %arg2[%c0, %c0_0, %c0_1] : memref<1x64x256xf32, #tpu.memory_space<vmem>>, vector<1x64x256xf32>
    %1 = vector.shape_cast %0 : vector<1x64x256xf32> to vector<64x256xf32>
    %2 = arith.truncf %1 : vector<64x256xf32> to vector<64x256xbf16>
    %c0_2 = arith.constant 0 : index
    %c0_3 = arith.constant 0 : index
    %3 = vector.load %arg3[%c0_2, %c0_3] : memref<256x768xbf16, #tpu.memory_space<vmem>>, vector<256x768xbf16>
    %cst = arith.constant dense<0.000000e+00> : vector<64x768xf32>
    %4 = tpu.matmul %2, %3, %cst {dimension_numbers = #tpu.dot_dimension_numbers<[1], [0], [0], [1], [0, 0, 1, 1], [], []>} : vector<64x256xbf16>, vector<256x768xbf16>, vector<64x768xf32> -> vector<64x768xf32>
    %c0_4 = arith.constant 0 : index
    %c0_5 = arith.constant 0 : index
    %5 = vector.load %arg4[%c0_4, %c0_5] : memref<64x128xf32, #tpu.memory_space<vmem>>, vector<64x128xf32>
    %c0_6 = arith.constant 0 : index
    %c0_7 = arith.constant 0 : index
    %6 = vector.load %arg5[%c0_6, %c0_7] : memref<64x128xf32, #tpu.memory_space<vmem>>, vector<64x128xf32>
    %7 = vector.extract_strided_slice %4 {offsets = [0, 0], sizes = [64, 128], strides = [1, 1]} : vector<64x768xf32> to vector<64x128xf32>
    %8 = vector.extract_strided_slice %4 {offsets = [0, 256], sizes = [64, 128], strides = [1, 1]} : vector<64x768xf32> to vector<64x128xf32>
    %9 = arith.mulf %7, %5 : vector<64x128xf32>
    %c64_i32 = arith.constant 64 : i32
    %10 = tpu.dynamic_rotate %7 by %c64_i32 dim 1 : vector<64x128xf32>, i32 -> vector<64x128xf32>
    %11 = arith.mulf %10, %6 : vector<64x128xf32>
    %12 = arith.addf %9, %11 : vector<64x128xf32>
    %13 = arith.truncf %12 : vector<64x128xf32> to vector<64x128xbf16>
    %c0_8 = arith.constant 0 : index
    %c0_9 = arith.constant 0 : index
    %c0_10 = arith.constant 0 : index
    %14 = vector.load %arg6[%c0_8, %c0_9, %c0_10] : memref<1x64x256xbf16, #tpu.memory_space<vmem>>, vector<1x64x128xbf16>
    %15 = vector.shape_cast %14 : vector<1x64x128xbf16> to vector<64x128xbf16>
    %16 = vector.shape_cast %13 : vector<64x128xbf16> to vector<1x64x128xbf16>
    tpu.vector_store %arg6[%c0_8, %c0_9, %c0_10], %16 {strides = array<i32>} : memref<1x64x256xbf16, #tpu.memory_space<vmem>>, vector<1x64x128xbf16>,
    %17 = arith.mulf %8, %5 : vector<64x128xf32>
    %c64_i32_11 = arith.constant 64 : i32
    %18 = tpu.dynamic_rotate %8 by %c64_i32_11 dim 1 : vector<64x128xf32>, i32 -> vector<64x128xf32>
    %19 = arith.mulf %18, %6 : vector<64x128xf32>
    %20 = arith.addf %17, %19 : vector<64x128xf32>
    %21 = arith.truncf %20 : vector<64x128xf32> to vector<64x128xbf16>
    %c0_12 = arith.constant 0 : index
    %c0_13 = arith.constant 0 : index
    %c0_14 = arith.constant 0 : index
    %22 = vector.load %arg7[%c0_12, %c0_13, %c0_14] : memref<1x64x256xbf16, #tpu.memory_space<vmem>>, vector<1x64x128xbf16>
    %23 = vector.shape_cast %22 : vector<1x64x128xbf16> to vector<64x128xbf16>
    %24 = vector.shape_cast %21 : vector<64x128xbf16> to vector<1x64x128xbf16>
    tpu.vector_store %arg7[%c0_12, %c0_13, %c0_14], %24 {strides = array<i32>} : memref<1x64x256xbf16, #tpu.memory_space<vmem>>, vector<1x64x128xbf16>,
    %25 = vector.extract_strided_slice %4 {offsets = [0, 128], sizes = [64, 128], strides = [1, 1]} : vector<64x768xf32> to vector<64x128xf32>
    %26 = vector.extract_strided_slice %4 {offsets = [0, 384], sizes = [64, 128], strides = [1, 1]} : vector<64x768xf32> to vector<64x128xf32>
    %27 = arith.mulf %25, %5 : vector<64x128xf32>
    %c64_i32_15 = arith.constant 64 : i32
    %28 = tpu.dynamic_rotate %25 by %c64_i32_15 dim 1 : vector<64x128xf32>, i32 -> vector<64x128xf32>
    %29 = arith.mulf %28, %6 : vector<64x128xf32>
    %30 = arith.addf %27, %29 : vector<64x128xf32>
    %31 = arith.truncf %30 : vector<64x128xf32> to vector<64x128xbf16>
    %c0_16 = arith.constant 0 : index
    %c0_17 = arith.constant 0 : index
    %c128 = arith.constant 128 : index
    %32 = vector.load %arg6[%c0_16, %c0_17, %c128] : memref<1x64x256xbf16, #tpu.memory_space<vmem>>, vector<1x64x128xbf16>
    %33 = vector.shape_cast %32 : vector<1x64x128xbf16> to vector<64x128xbf16>
    %34 = vector.shape_cast %31 : vector<64x128xbf16> to vector<1x64x128xbf16>
    tpu.vector_store %arg6[%c0_16, %c0_17, %c128], %34 {strides = array<i32>} : memref<1x64x256xbf16, #tpu.memory_space<vmem>>, vector<1x64x128xbf16>,
    %35 = arith.mulf %26, %5 : vector<64x128xf32>
    %c64_i32_18 = arith.constant 64 : i32
    %36 = tpu.dynamic_rotate %26 by %c64_i32_18 dim 1 : vector<64x128xf32>, i32 -> vector<64x128xf32>
    %37 = arith.mulf %36, %6 : vector<64x128xf32>
    %38 = arith.addf %35, %37 : vector<64x128xf32>
    %39 = arith.truncf %38 : vector<64x128xf32> to vector<64x128xbf16>
    %c0_19 = arith.constant 0 : index
    %c0_20 = arith.constant 0 : index
    %c128_21 = arith.constant 128 : index
    %40 = vector.load %arg7[%c0_19, %c0_20, %c128_21] : memref<1x64x256xbf16, #tpu.memory_space<vmem>>, vector<1x64x128xbf16>
    %41 = vector.shape_cast %40 : vector<1x64x128xbf16> to vector<64x128xbf16>
    %42 = vector.shape_cast %39 : vector<64x128xbf16> to vector<1x64x128xbf16>
    tpu.vector_store %arg7[%c0_19, %c0_20, %c128_21], %42 {strides = array<i32>} : memref<1x64x256xbf16, #tpu.memory_space<vmem>>, vector<1x64x128xbf16>,
    %43 = vector.extract_strided_slice %4 {offsets = [0, 512], sizes = [64, 256], strides = [1, 1]} : vector<64x768xf32> to vector<64x256xf32>
    %44 = arith.truncf %43 : vector<64x256xf32> to vector<64x256xbf16>
    %c0_22 = arith.constant 0 : index
    %c0_23 = arith.constant 0 : index
    %c0_24 = arith.constant 0 : index
    %45 = vector.load %arg8[%c0_22, %c0_23, %c0_24] : memref<1x64x256xbf16, #tpu.memory_space<vmem>>, vector<1x64x256xbf16>
    %46 = vector.shape_cast %45 : vector<1x64x256xbf16> to vector<64x256xbf16>
    %47 = vector.shape_cast %44 : vector<64x256xbf16> to vector<1x64x256xbf16>
    tpu.vector_store %arg8[%c0_22, %c0_23, %c0_24], %47 {strides = array<i32>} : memref<1x64x256xbf16, #tpu.memory_space<vmem>>, vector<1x64x256xbf16>,
    return
  }
  func.func @transform_0(%arg0: i32, %arg1: i32) -> (i32, i32, i32) {
    %c0_i32 = arith.constant 0 : i32
    %c0_i32_0 = arith.constant 0 : i32
    return %arg0, %arg1, %c0_i32 : i32, i32, i32
  }
  func.func @transform_1(%arg0: i32, %arg1: i32) -> (i32, i32) {
    %c0_i32 = arith.constant 0 : i32
    %c0_i32_0 = arith.constant 0 : i32
    %c0_i32_1 = arith.constant 0 : i32
    return %c0_i32, %c0_i32_0 : i32, i32
  }
  func.func @transform_2(%arg0: i32, %arg1: i32) -> (i32, i32) {
    %c0_i32 = arith.constant 0 : i32
    %c0_i32_0 = arith.constant 0 : i32
    return %arg1, %c0_i32 : i32, i32
  }
  func.func @transform_3(%arg0: i32, %arg1: i32) -> (i32, i32) {
    %c0_i32 = arith.constant 0 : i32
    %c0_i32_0 = arith.constant 0 : i32
    return %arg1, %c0_i32 : i32, i32
  }
  func.func @transform_4(%arg0: i32, %arg1: i32) -> (i32, i32, i32) {
    %c0_i32 = arith.constant 0 : i32
    %c0_i32_0 = arith.constant 0 : i32
    return %arg0, %arg1, %c0_i32 : i32, i32, i32
  }
  func.func @transform_5(%arg0: i32, %arg1: i32) -> (i32, i32, i32) {
    %c0_i32 = arith.constant 0 : i32
    %c0_i32_0 = arith.constant 0 : i32
    return %arg0, %arg1, %c0_i32 : i32, i32, i32
  }
  func.func @transform_6(%arg0: i32, %arg1: i32) -> (i32, i32, i32) {
    %c0_i32 = arith.constant 0 : i32
    %c0_i32_0 = arith.constant 0 : i32
    return %arg0, %arg1, %c0_i32 : i32, i32, i32
  }
}

</mosaic_0001>

<bundles_post_ra>
// kernel: tpu_custom_call.1
= control target key start
LH: loop header
LB: loop body
LE: loop exit
PB: predicated region body
PF: predicated region fallthrough
CT: control target
= control target key end

     0   :  { %s3550_s0 = inlined_call_operand.hbm [shape: f32[2,192,256], index: 0, kind: input, shape index: {}]   ;;  %s3551_s1 = inlined_call_operand.hbm [shape: bf16[256,768], index: 1, kind: input, shape index: {}]   ;;  %s3552_s2 = inlined_call_operand.hbm [shape: f32[192,128], index: 2, kind: input, shape index: {}]   ;;  %s3553_s3 = inlined_call_operand.hbm [shape: f32[192,128], index: 3, kind: input, shape index: {}]   ;;  %s3554_s4 = inlined_call_operand.hbm [shape: bf16[2,192,256], index: 4, kind: output, shape index: {0}]   ;;  %s3555_s5 = inlined_call_operand.hbm [shape: bf16[2,192,256], index: 5, kind: output, shape index: {1}]   ;;  %s3556_s6 = inlined_call_operand.hbm [shape: bf16[2,192,256], index: 6, kind: output, shape index: {2}]  }
   0x1   :  { %3581 = sst [smem:[#allocation25_spill]] %s3550_s0 }
   0x2   :  { %3582 = sst [smem:[#allocation26_spill]] %s3551_s1 }
   0x3   :  { %3583 = sst [smem:[#allocation27_spill]] %s3552_s2 }
   0x4   :  { %3584 = sst [smem:[#allocation28_spill]] %s3553_s3 }
   0x5   :  { %3585 = sst [smem:[#allocation29_spill]] %s3554_s4 }
   0x6   :  { %3586 = sst [smem:[#allocation30_spill]] %s3555_s5 }
   0x7   :  { %3587 = sst [smem:[#allocation31_spill]] %s3556_s6 }
   0x8   :  { %12 = vsyncpa [#allocation3], 0 }
   0x9   :  { %14 = vsyncpa [#allocation3 + $0x1], 0 }
   0xa   :  { %15 = vsyncpa [#allocation6], 0 }
   0xb   :  { %16 = vsyncpa [#allocation4], 0 }
   0xc   :  { %18 = vsyncpa [#allocation4 + $0x1], 0 }
   0xd   :  { %19 = vsyncpa [#allocation11], 0 }
   0xe   :  { %21 = vsyncpa [#allocation11 + $0x1], 0  ;;  %s2791_s21 = smov 0   ;;  %s2793_s22 = smov 0  }
   0xf   :  { %s2795_s23 = smov 0   ;;  %s2797_s24 = smov 0  }
  0x10   :  { %s2799_s25 = smov 0   ;;  %s2801_s26 = smov 0  }
  0x11   :  { %s2803_s27 = smov 0   ;;  %s2805_s28 = smov 0  }
  0x12   :  { %s2807_s29 = smov 0   ;;  %s2809_s30 = smov 0  }
  0x13   :  { %s2811_s7 = smov 0  }
  0x14 LB: > { %3588 = sst [smem:[#allocation18_spill]] %s2718_s26  ;;  %s36_s8 = sadd.s32 1, %s2730_s29  ;;  %s2738_s7 = sphi %s2811_s7, %s27_s7   ;;  %s2734_s30 = sphi %s2809_s30, %s3635_s30   ;;  %s2730_s29 = sphi %s2807_s29, %s3642_s29   ;;  %s2726_s28 = sphi %s2805_s28, %s3633_s28   ;;  %s2722_s27 = sphi %s2803_s27, %s3641_s27   ;;  %s2718_s26 = sphi %s2801_s26, %s3632_s26   ;;  %s2714_s25 = sphi %s2799_s25, %s3640_s25   ;;  %s2710_s24 = sphi %s2797_s24, %s3639_s24   ;;  %s2706_s23 = sphi %s2795_s23, %s3638_s23   ;;  %s2702_s22 = sphi %s2793_s22, %s3637_s22   ;;  %s2698_s21 = sphi %s2791_s21, %s3636_s21  }
  0x15   : > { %3589 = sst [smem:[#allocation19_spill]] %s2722_s27  ;;  %s39_s9 = sadd.s32 1, %s2734_s30 }
  0x16   : > { %3590 = sst [smem:[#allocation20_spill]] %s2726_s28  ;;  %p37_p0 = scmp.ge.s32.totalorder %s36_s8, 3 }
  0x17   : > { %3591 = sst [smem:[#allocation21_spill]] %s2734_s30  ;;  %s48_s10 = sadd.s32 1, %s2718_s26 }
  0x18   : > { %p3562_p1 = scmp.ne.s32.totalorder %s2718_s26, %s2714_s25  ;;  %p3564_p2 = scmp.eq.s32.totalorder %s2738_s7, 0 }
  0x19   : > { %s3644_s8 = smov (%p37_p0, %s36_s8), 0  ;;  %s3646_s9 = smov (!%p37_p0, %s39_s9), %s2734_s30 }
  0x1a   : > { %3592 = sst [smem:[#allocation22_spill]] %s3644_s8  ;;  %s2857_s11 = ssub.s32 %s2730_s29, %s3644_s8 }
  0x1b   : > { %p2864_p3 = por %p3564_p2, %p3562_p1  ;;  %p41_p4 = scmp.ge.s32.totalorder %s3646_s9, 2 }
  0x1c   : > { %p93_p5 = scmp.eq.s32.totalorder %s2857_s11, 0  ;;  %p3563_p6 = scmp.lt.s32.totalorder %s2738_s7, 6 }
  0x1d   : > { %s3648_s9 = smov (%p41_p4, %s3646_s9), 0  ;;  %s255_s13 = sand.u32 1, %s2738_s7  }
  0x1e   : > { %3594 = sst [smem:[#allocation23_spill]] %s3648_s9  ;;  %s257_s14 = sand.u32 1, %s2718_s26  }
  0x1f   : > { %s43_s15 = ssub.s32 %s2734_s30, %s3648_s9  ;;  %s1894_s17 = sshll.u32 %s257_s14, 7 }
  0x20   : > { %s45_s16 = sor.u32 %s2857_s11, %s43_s15  ;;  %s2062_s18 = sshll.u32 %s2730_s29, 4 }
  0x21   : > { %p46_p7 = scmp.eq.s32.totalorder %s45_s16, 0  ;;  %s2140_s19 = smul.u32 48, %s2734_s30 }
  0x22   : > { %s259_s4 = scalar_lea.vmem [#allocation2], %s1894_s17  ;;  %s3596_s0 = sld [smem:[#allocation25_spill]] }
  0x23   : > { %s2880_s20 = scalar_select %p46_p7, %s2718_s26, %s48_s10  }
  0x24   : > { %s266_s8 = sadd.s32 %s2140_s19, %s2062_s18  ;;  %s269_s6 = sshll.u32 %s259_s4, 4  ;;  %s2882_s6 = int_to_ptr.vmem [resolvable:$true] %s269_s6 }
  0x25   : > { %3595 = sst [smem:[#allocation24_spill]] %s2880_s20  ;;  %s1897_s5 = sshll.u32 %s266_s8, 7 }
  0x26   : > { %p2893_p8 = pnand %p3563_p6, %p2864_p3  ;;  %s2897_s4 = scalar_lea.sflag [#allocation3], %s255_s13 }
  0x28   : > { %s2887_s1 = scalar_lea.hbm %s3596_s0, %s1897_s5  ;;  %p2432_p10 = pneg %p2893_p8 }
  0x29   : > { %s2430_s8 = scalar_lea.hbm %s2887_s1, 2048  ;;  %s2435_s28 = scalar_lea.hbm %s3596_s0, 12288 }
  0x2a   : > { %p2431_p9 = scmp.ne.s32.totalorder %s2887_s1, %s2430_s8  ;;  %p2436_p13 = scmp.lt.u32.totalorder %s2887_s1, %s3596_s0 }
  0x2b   : > { %p2437_p0 = scmp.lt.u32.totalorder %s2435_s28, %s2430_s8  ;;  %p2439_p4 = scmp.lt.u32.totalorder %s2430_s8, %s2887_s1 }
  0x2c   : > { %p2433_p11 = pnand %p2432_p10, %p2431_p9 }
  0x2d   : > { %p2438_p3 = por %p2437_p0, %p2436_p13 }
  0x2e   : > { %p2434_p12 = pneg %p2433_p11 }
  0x2f   : > { %p2440_p7 = por %p2439_p4, %p2438_p3 }
  0x31   : > { %p2441_p1 = pnand %p2440_p7, %p2434_p12 }
  0x33   : > { %2444 = shalt.err (!%p2441_p1)
}
  0x34   : > { %s2445_s13 = scalar_lea.vmem %s2882_s6, 2048  ;;  %s2740_s15 = smov [#allocation2]  }
  0x35   : > { %p2446_p9 = scmp.ne.s32.totalorder %s2882_s6, %s2445_s13  ;;  %s2450_s16 = sshll.u32 %s2740_s15, 4  ;;  %s2451_s16 = int_to_ptr.vmem [resolvable:$false] %s2450_s16 }
  0x36   : > { %s2452_s17 = scalar_lea.vmem %s2451_s16, 4096  ;;  %p2453_p2 = scmp.lt.s32.totalorder %s2882_s6, %s2451_s16 }
  0x37   : > { %p2448_p11 = pnand %p2446_p9, %p2432_p10  ;;  %p2454_p13 = scmp.lt.s32.totalorder %s2452_s17, %s2445_s13 }
  0x39   : > { %p2449_p6 = pneg %p2448_p11  ;;  %p2455_p0 = por %p2454_p13, %p2453_p2 }
  0x3b   : > { %p2456_p3 = pnand %p2455_p0, %p2449_p6 }
  0x3d   : > { %2459 = shalt.err (!%p2456_p3)
}
  0x3e   : > { %s2741_s18 = smov 256   ;;  %s2742_s19 = smov 16  }
  0x3f   : > { %2167 = dma.hbm_to_vmem [thread:$0]  (!%p2893_p8), %s2887_s1, 2048, %s2882_s6, %s2897_s4, %s2741_s18, %s2741_s18, %s2742_s19  }
  0x40   : > { %s2063_s8 = sshll.u32 %s2730_s29, 10  ;;  %s95_s5 = sadd.s32 1, %s2706_s23 }
  0x41   : > { %p102_p1 = scmp.ne.s32.totalorder %s2706_s23, %s2702_s22  ;;  %p3598_p2 = scmp.eq.s32.totalorder %s2738_s7, 0 }
  0x42   : > { %s2932_s27 = scalar_select %p93_p5, %s2706_s23, %s95_s5  }
  0x43   : > { %p104_p6 = por %p102_p1, %p3598_p2  ;;  %s281_s28 = sand.u32 1, %s2706_s23  }
  0x44   : > { %s2937_s12 = sshll.u32 %s281_s28, 6  ;;  %s3599_s2 = sld [smem:[#allocation27_spill]] }
  0x45   : > { %p3600_p10 = scmp.lt.s32.totalorder %s2738_s7, 6  ;;  %s283_s6 = scalar_lea.vmem [#allocation7], %s2937_s12 }
  0x46   : > { %s290_s11 = sshll.u32 %s283_s6, 4  ;;  %s2953_s11 = int_to_ptr.vmem [resolvable:$true] %s290_s11 }
  0x47   : > { %p2948_p8 = pnand %p3600_p10, %p104_p6 }
  0x49   : > { %s3601_s1 = scalar_select %p2948_p8, 1, 0 }
  0x4a   : > { %s2944_s15 = scalar_lea.hbm %s3599_s2, %s2063_s8  ;;  %p3565_p12 = pneg %p2948_p8 }
  0x4b   : > { %s2460_s10 = scalar_lea.hbm %s2944_s15, 1024  ;;  %s2465_s18 = scalar_lea.hbm %s3599_s2, 3072 }
  0x4c   : > { %p2461_p5 = scmp.ne.s32.totalorder %s2944_s15, %s2460_s10  ;;  %p2466_p9 = scmp.lt.u32.totalorder %s2944_s15, %s3599_s2 }
  0x4d   : > { %p2467_p11 = scmp.lt.u32.totalorder %s2465_s18, %s2460_s10  ;;  %p2469_p0 = scmp.lt.u32.totalorder %s2460_s10, %s2944_s15 }
  0x4e   : > { %p2463_p4 = pnand %p3565_p12, %p2461_p5 }
  0x4f   : > { %p2468_p13 = por %p2467_p11, %p2466_p9 }
  0x50   : > { %p2464_p7 = pneg %p2463_p4 }
  0x51   : > { %p2470_p3 = por %p2469_p0, %p2468_p13 }
  0x53   : > { %p2471_p1 = pnand %p2470_p3, %p2464_p7 }
  0x55   : > { %2474 = shalt.err (!%p2471_p1)
}
  0x56   : > { %s2475_s28 = scalar_lea.vmem %s2953_s11, 1024  ;;  %s2743_s14 = smov [#allocation7]  }
  0x57   : > { %p2476_p2 = scmp.ne.s32.totalorder %s2953_s11, %s2475_s28  ;;  %s2480_s13 = sshll.u32 %s2743_s14, 4  ;;  %s2481_s13 = int_to_ptr.vmem [resolvable:$false] %s2480_s13 }
  0x58   : > { %s2482_s6 = scalar_lea.vmem %s2481_s13, 2048  ;;  %p2483_p5 = scmp.lt.s32.totalorder %s2953_s11, %s2481_s13 }
  0x59   : > { %p2478_p6 = pnand %p2476_p2, %p3565_p12  ;;  %p2484_p4 = scmp.lt.s32.totalorder %s2482_s6, %s2475_s28 }
  0x5b   : > { %p2479_p10 = pneg %p2478_p6  ;;  %p2485_p9 = por %p2484_p4, %p2483_p5 }
  0x5d   : > { %p2486_p11 = pnand %p2485_p9, %p2479_p10 }
  0x5f   : > { %2489 = shalt.err (!%p2486_p11)
}
  0x60   : > { %s3567_s10 = smov 128   ;;  %s3568_s16 = smov 8  }
  0x61   : > { %2170 = dma.hbm_to_vmem [thread:$0]  (!%p2948_p8), %s2944_s15, 1024, %s2953_s11, %s2897_s4, %s3567_s10, %s3567_s10, %s3568_s16  }
  0x62   : > { %s2985_s17 = sadd.s32 4294967295, %s2738_s7   ;;  %s3566_s18 = sadd.s32 4294967294, %s2738_s7  }
  0x63   : > { %p61_p7 = scmp.ne.s32.totalorder %s2714_s25, %s2710_s24  ;;  %p3572_p13 = scmp.eq.s32.totalorder %s2985_s17, 0 }
  0x64   : > { %p108_p0 = scmp.ne.s32.totalorder %s2702_s22, %s2698_s21  ;;  %p160_p3 = scmp.eq.s32.totalorder %s2985_s17, 5 }
  0x65   : > { %p166_p1 = scmp.eq.s32.totalorder %s3566_s18, 5  ;;  %p2998_p2 = por %p3572_p13, %p61_p7 }
  0x66   : > { %p3004_p6 = por %p108_p0, %p3572_p13  ;;  %p3604_p10 = scmp.ne.s32.totalorder %s2718_s26, %s2714_s25 }
  0x67   : > { %s3602_s19 = scalar_select %p2998_p2, 1, 0 }
  0x68   : > { %s3603_s15 = scalar_select %p3004_p6, 1, 0 }
  0x69   : > { %p3011_p5 = por %p160_p3, %p3604_p10  ;;  %p3015_p4 = por %p166_p1, %p61_p7 }
  0x6a   : > { %p1891_p9 = scmp.ge.s32.totalorder %s2738_s7, 1  ;;  %p229_p11 = scmp.lt.s32.totalorder %s2738_s7, 7 }
  0x6b   : > { %s3605_s11 = scalar_select %p3011_p5, 1, 0 }
  0x6c   : > { %s3606_s21 = scalar_select %p3015_p4, 1, 0 }
  0x6d   : > { %p3021_p12 = pnand %p1891_p9, %p229_p11  ;;  %s2746_s28 = smov [#allocation5]  }
  0x6e   : > { %s241_s14 = sshll.u32 %s2746_s28, 4  ;;  %s304_s6 = scalar_lea.vmem [#allocation8], %s2937_s12  ;;  %s3025_s14 = int_to_ptr.vmem [resolvable:$true] %s241_s14 }
  0x6f   : > { %s3607_s5 = scalar_select %p3021_p12, 1, 0 }
  0x70   : > { %p2160_p0 = pneg %p3021_p12  ;;  %s311_s18 = sshll.u32 %s304_s6, 4  ;;  %s3043_s18 = int_to_ptr.vmem [resolvable:$true] %s311_s18 }
  0x71   : > { %s3609_s3 = sld [smem:[#allocation28_spill]]  ;;  %s3610_s9 = sld [smem:[#allocation26_spill]] }
  0x72   : > { %p3031_p3 = pnand %p2160_p0, %p3572_p13 }
  0x74   : > { %p2492_p1 = pneg %p3031_p3 }
  0x77   : > { %s3041_s0 = scalar_lea.hbm %s3609_s3, %s2063_s8  ;;  %s2490_s30 = scalar_lea.hbm %s3610_s9, 12288 }
  0x78   : > { %p2491_p7 = scmp.ne.s32.totalorder %s3610_s9, %s2490_s30  ;;  %p2497_p11 = scmp.lt.u32.totalorder %s2490_s30, %s3610_s9 }
  0x7a   : > { %p2493_p10 = pnand %p2492_p1, %p2491_p7 }
  0x7c   : > { %p2494_p9 = pneg %p2493_p10 }
  0x7e   : > { %p2499_p0 = pnand %p2497_p11, %p2494_p9 }
  0x80   : > { %2502 = shalt.err (!%p2499_p0)
}
  0x81   : > { %s2503_s8 = scalar_lea.vmem %s3025_s14, 12288  ;;  %p2511_p6 = scmp.lt.s32.totalorder %s3025_s14, %s3025_s14 }
  0x82   : > { %p2504_p13 = scmp.ne.s32.totalorder %s3025_s14, %s2503_s8  ;;  %p2512_p2 = scmp.lt.s32.totalorder %s2503_s8, %s2503_s8 }
  0x84   : > { %p2506_p4 = pnand %p2504_p13, %p2492_p1  ;;  %p2513_p12 = por %p2512_p2, %p2511_p6 }
  0x86   : > { %p2507_p5 = pneg %p2506_p4 }
  0x88   : > { %p2514_p8 = pnand %p2513_p12, %p2507_p5 }
  0x8a   : > { %2517 = shalt.err (!%p2514_p8)
}
  0x8b   : > { %s2747_s2 = smov 384   ;;  %s2748_s26 = smov 24  }
  0x8c   : > { %2163 = dma.hbm_to_vmem [thread:$0]  (!%p3031_p3), %s3610_s9, 12288, %s3025_s14, [#allocation6], %s2747_s2, %s2747_s2, %s2748_s26  }
  0x8d   : > { %s2518_s10 = scalar_lea.hbm %s3041_s0, 1024  ;;  %p3611_p4 = scmp.ne.s32.totalorder %s3601_s1, 0 }
  0x8e   : > { %p2519_p13 = scmp.ne.s32.totalorder %s3041_s0, %s2518_s10  ;;  %s2523_s12 = scalar_lea.hbm %s3609_s3, 3072 }
  0x8f   : > { %p3612_p2 = pneg %p3611_p4  ;;  %p2524_p6 = scmp.lt.u32.totalorder %s3041_s0, %s3609_s3 }
  0x90   : > { %p2525_p5 = scmp.lt.u32.totalorder %s2523_s12, %s2518_s10  ;;  %p2527_p1 = scmp.lt.u32.totalorder %s2518_s10, %s3041_s0 }
  0x91   : > { %p2521_p12 = pnand %p2519_p13, %p3612_p2 }
  0x92   : > { %p2526_p7 = por %p2525_p5, %p2524_p6 }
  0x93   : > { %p2522_p8 = pneg %p2521_p12 }
  0x94   : > { %p2528_p10 = por %p2527_p1, %p2526_p7 }
  0x96   : > { %p2529_p9 = pnand %p2528_p10, %p2522_p8 }
  0x98   : > { %2532 = shalt.err (!%p2529_p9)
}
  0x99   : > { %s2533_s14 = scalar_lea.vmem %s3043_s18, 1024  ;;  %p3613_p11 = pmov %p3612_p2 }
  0x9a   : > { %p2534_p3 = scmp.ne.s32.totalorder %s3043_s18, %s2533_s14  ;;  %s2749_s13 = smov [#allocation8]  }
  0x9b   : > { %s2538_s2 = sshll.u32 %s2749_s13, 4  ;;  %s2539_s2 = int_to_ptr.vmem [resolvable:$false] %s2538_s2 }
  0x9c   : > { %p2536_p0 = pnand %p2534_p3, %p3613_p11  ;;  %s2540_s26 = scalar_lea.vmem %s2539_s2, 2048 }
  0x9d   : > { %p2541_p2 = scmp.lt.s32.totalorder %s3043_s18, %s2539_s2  ;;  %p2542_p12 = scmp.lt.s32.totalorder %s2540_s26, %s2533_s14 }
  0x9e   : > { %p2537_p13 = pneg %p2536_p0 }
  0x9f   : > { %p2543_p6 = por %p2542_p12, %p2541_p2 }
  0xa1   : > { %p2544_p5 = pnand %p2543_p6, %p2537_p13 }
  0xa3   : > { %2547 = shalt.err (!%p2544_p5)
}
  0xa4   : > { %s3614_s30 = smov 8   ;;  %s3615_s20 = smov 128  }
  0xa5   : > { %2173 = dma.hbm_to_vmem [thread:$0]  (!%p3611_p4), %s3041_s0, 1024, %s3043_s18, %s2897_s4, %s3615_s20, %s3615_s20, %s3614_s30  }
  0xa6   : > { %p3616_p8 = scmp.ne.s32.totalorder %s3607_s5, 0 }
  0xa7   : > { %s3579_s10 = sand.u32 (!%p3616_p8), 1, %s2985_s17   ;;  %s3097_s16 = sand.u32 (!%p3616_p8), 1, %s2714_s25  }
  0xa8   : > { %323 = sbr.rel (%p3616_p8) target bundleno = 705 (0x2c1), region = 36  ;;  %s1905_s28 = sshll.u32 (!%p3616_p8), %s3097_s16, 7 }
  0xa9   : > { %s326_s1 = scalar_lea.sflag (!%p3616_p8), [#allocation3], %s3579_s10  ;;  %s3102_s12 = scalar_lea.vmem (!%p3616_p8), [#allocation2], %s1905_s28 }
  0xaa   : > { %p3617_p7 = scmp.ne.s32.totalorder (!%p3616_p8), %s3602_s19, 0 }
  0xaf   : > { %2677 = dma.done.wait (%p3617_p7), %s326_s1, 2048  }
  0xb0   : > { %2679 = vsyncadd (%p3617_p7), %s326_s1, 4294965248  ;;  %p3618_p4 = scmp.eq.s32.totalorder %s2985_s17, 0 }
  0xb2   : > { %2681 = dma.done.wait (%p3618_p4), [#allocation6], 12288   ;;  %p3619_p1 = pmov %p3618_p4 }
  0xb3   : > { %s340_s0 = sand.u32 1, %s2702_s22   ;;  %p3620_p10 = scmp.ne.s32.totalorder %s3603_s15, 0 }
  0xb4   : > { %2683 = vsyncadd (%p3619_p1), [#allocation6], 4294955008  ;;  %s3113_s4 = sshll.u32 %s340_s0, 6 }
  0xb5   : > { %s3116_s18 = scalar_lea.vmem [#allocation7], %s3113_s4 }
  0xb6   : > { %2685 = dma.done.wait (%p3620_p10), %s326_s1, 2048  }
  0xb7   : > { %2687 = vsyncadd (%p3620_p10), %s326_s1, 4294965248  ;;  %v2286_v0 = vld [vmem:[#allocation5 + $0x4] ss:$24 sps:$4 sm:$0xff]   ;;  %v2290_v2 = vld [vmem:[#allocation5] ss:$24 sps:$4 sm:$0xff]   ;;  %s2750_s19 = smov 64  }
  0xb8   : > { %v2288_v1 = vld [vmem:[#allocation5 + $0xc] ss:$24 sps:$4 sm:$0xff]   ;;  %1006 = vmatprep.subr.bf16.mxu0 %v2286_v0  ;;  %v2291_v3 = vld [vmem:[#allocation5 + $0x8] ss:$24 sps:$4 sm:$0xff]   ;;  %v2294_v5 = vld [vmem:[#allocation5 + $0x3c] ss:$24 sps:$4 sm:$0xff]  }
  0xb9   : > { %1079 = vmatprep.subr.bf16.mxu1 %v2288_v1  ;;  %v2292_v4 = vld [vmem:[#allocation5 + $0x34] ss:$24 sps:$4 sm:$0xff]   ;;  %1007 = vmatpush1.bf16.msra.mxu0 %v2290_v2  ;;  %v2296_v6 = vld [vmem:[#allocation5 + $0x30] ss:$24 sps:$4 sm:$0xff]   ;;  %v2298_v8 = vld [vmem:[#allocation5 + $0x64] ss:$24 sps:$4 sm:$0xff]  }
  0xba   : > { %1080 = vmatpush1.bf16.msra.mxu1 %v2291_v3  ;;  %1008 = vmatprep.subr.bf16.mxu0 %v2292_v4  ;;  %v2297_v7 = vld [vmem:[#allocation5 + $0x38] ss:$24 sps:$4 sm:$0xff]   ;;  %v2300_v9 = vld [vmem:[#allocation5 + $0x6c] ss:$24 sps:$4 sm:$0xff]   ;;  %v2303_v11 = vld [vmem:[#allocation5 + $0x68] ss:$24 sps:$4 sm:$0xff]  }
  0xbb   : > { %1081 = vmatprep.subr.bf16.mxu1 %v2294_v5  ;;  %v2302_v10 = vld [vmem:[#allocation5 + $0x60] ss:$24 sps:$4 sm:$0xff]   ;;  %v2304_v12 = vld [vmem:[#allocation5 + $0x94] ss:$24 sps:$4 sm:$0xff]   ;;  %v2308_v14 = vld [vmem:[#allocation5 + $0x90] ss:$24 sps:$4 sm:$0xff]  }
  0xbc   : > { %v2306_v13 = vld [vmem:[#allocation5 + $0x9c] ss:$24 sps:$4 sm:$0xff]   ;;  %v2309_v15 = vld [vmem:[#allocation5 + $0x98] ss:$24 sps:$4 sm:$0xff]   ;;  %v2312_v17 = vld [vmem:[#allocation5 + $0xcc] ss:$24 sps:$4 sm:$0xff]  }
  0xbd   : > { %1009 = vmatpush1.bf16.msra.mxu0 %v2296_v6  ;;  %v2310_v16 = vld [vmem:[#allocation5 + $0xc4] ss:$24 sps:$4 sm:$0xff]   ;;  %v2314_v18 = vld [vmem:[#allocation5 + $0xc0] ss:$24 sps:$4 sm:$0xff]   ;;  %v2316_v20 = vld [vmem:[#allocation5 + $0xf4] ss:$24 sps:$4 sm:$0xff]  }
  0xbe   : > { %1082 = vmatpush1.bf16.msra.mxu1 %v2297_v7  ;;  %1010 = vmatprep.subr.bf16.mxu0 %v2298_v8  ;;  %v2315_v19 = vld [vmem:[#allocation5 + $0xc8] ss:$24 sps:$4 sm:$0xff]   ;;  %v2318_v21 = vld [vmem:[#allocation5 + $0xfc] ss:$24 sps:$4 sm:$0xff]   ;;  %v2321_v23 = vld [vmem:[#allocation5 + $0xf8] ss:$24 sps:$4 sm:$0xff]  }
  0xbf   : > { %1083 = vmatprep.subr.bf16.mxu1 %v2300_v9  ;;  %v2320_v22 = vld [vmem:[#allocation5 + $0xf0] ss:$24 sps:$4 sm:$0xff]   ;;  %v2322_v24 = vld [vmem:[#allocation5 + $0x124] ss:$24 sps:$4 sm:$0xff]   ;;  %v2326_v26 = vld [vmem:[#allocation5 + $0x120] ss:$24 sps:$4 sm:$0xff]  }
  0xc0   : > { %v2324_v25 = vld [vmem:[#allocation5 + $0x12c] ss:$24 sps:$4 sm:$0xff]   ;;  %v2327_v27 = vld [vmem:[#allocation5 + $0x128] ss:$24 sps:$4 sm:$0xff]   ;;  %v2330_v29 = vld [vmem:[#allocation5 + $0x15c] ss:$24 sps:$4 sm:$0xff]  }
  0xc1   : > { %1011 = vmatpush1.bf16.msra.mxu0 %v2302_v10  ;;  %v2328_v28 = vld [vmem:[#allocation5 + $0x154] ss:$24 sps:$4 sm:$0xff]   ;;  %v2332_v30 = vld [vmem:[#allocation5 + $0x150] ss:$24 sps:$4 sm:$0xff]   ;;  %v2334_v32 = vld [vmem:[#allocation5 + $0x184] ss:$24 sps:$4 sm:$0xff]  }
  0xc2   : > { %1084 = vmatpush1.bf16.msra.mxu1 %v2303_v11  ;;  %1012 = vmatprep.subr.bf16.mxu0 %v2304_v12  ;;  %v2333_v31 = vld [vmem:[#allocation5 + $0x158] ss:$24 sps:$4 sm:$0xff]   ;;  %v2336_v33 = vld [vmem:[#allocation5 + $0x18c] ss:$24 sps:$4 sm:$0xff]   ;;  %v2339_v35 = vld [vmem:[#allocation5 + $0x188] ss:$24 sps:$4 sm:$0xff]  }
  0xc3   : > { %1085 = vmatprep.subr.bf16.mxu1 %v2306_v13  ;;  %v2338_v34 = vld [vmem:[#allocation5 + $0x180] ss:$24 sps:$4 sm:$0xff]   ;;  %v2340_v36 = vld [vmem:[#allocation5 + $0x1b4] ss:$24 sps:$4 sm:$0xff]   ;;  %v2344_v38 = vld [vmem:[#allocation5 + $0x1b0] ss:$24 sps:$4 sm:$0xff]  }
  0xc4   : > { %v2342_v37 = vld [vmem:[#allocation5 + $0x1bc] ss:$24 sps:$4 sm:$0xff]   ;;  %v2345_v39 = vld [vmem:[#allocation5 + $0x1b8] ss:$24 sps:$4 sm:$0xff]   ;;  %v2348_v41 = vld [vmem:[#allocation5 + $0x1ec] ss:$24 sps:$4 sm:$0xff]  }
  0xc5   : > { %1013 = vmatpush1.bf16.msra.mxu0 %v2308_v14  ;;  %v2346_v40 = vld [vmem:[#allocation5 + $0x1e4] ss:$24 sps:$4 sm:$0xff]   ;;  %v2350_v42 = vld [vmem:[#allocation5 + $0x1e0] ss:$24 sps:$4 sm:$0xff]   ;;  %v2352_v44 = vld [vmem:[#allocation5 + $0x214] ss:$24 sps:$4 sm:$0xff]  }
  0xc6   : > { %1086 = vmatpush1.bf16.msra.mxu1 %v2309_v15  ;;  %1014 = vmatprep.subr.bf16.mxu0 %v2310_v16  ;;  %v2351_v43 = vld [vmem:[#allocation5 + $0x1e8] ss:$24 sps:$4 sm:$0xff]   ;;  %v2354_v45 = vld [vmem:[#allocation5 + $0x21c] ss:$24 sps:$4 sm:$0xff]   ;;  %v2357_v49 = vld [vmem:[#allocation5 + $0x218] ss:$24 sps:$4 sm:$0xff]  }
  0xc7   : > { %1087 = vmatprep.subr.bf16.mxu1 %v2312_v17  ;;  %v407_v46 = vld [vmem:[%s3102_s12 + $0x8] sm:$0xff]  ;;  %v409_v47 = vld [vmem:[%s3102_s12 + $0x18] sm:$0xff]  ;;  %v406_v3 = vld [vmem:[%s3102_s12] sm:$0xff]  ;;  %s3302_s15 = sshll.u32 %s3097_s16, 6  ;;  %s3316_s6 = scalar_lea.vmem [#allocation8], %s3113_s4 }
  0xc8   : > { %v2356_v48 = vld [vmem:[#allocation5 + $0x210] ss:$24 sps:$4 sm:$0xff]   ;;  %v3124_v50 = vpack.c.bf16 %v409_v47, %v407_v46  ;;  %v2358_v51 = vld [vmem:[#allocation5 + $0x244] ss:$24 sps:$4 sm:$0xff]   ;;  %v2362_v53 = vld [vmem:[#allocation5 + $0x240] ss:$24 sps:$4 sm:$0xff]  }
  0xc9   : > { %1015 = vmatpush1.bf16.msra.mxu0 %v2314_v18  ;;  %v2360_v52 = vld [vmem:[#allocation5 + $0x24c] ss:$24 sps:$4 sm:$0xff]   ;;  %v2363_v54 = vld [vmem:[#allocation5 + $0x248] ss:$24 sps:$4 sm:$0xff]   ;;  %v2366_v56 = vld [vmem:[#allocation5 + $0x27c] ss:$24 sps:$4 sm:$0xff]  }
  0xca   : > { %1088 = vmatpush1.bf16.msra.mxu1 %v2315_v19  ;;  %1016 = vmatprep.subr.bf16.mxu0 %v2316_v20  ;;  %v2364_v55 = vld [vmem:[#allocation5 + $0x274] ss:$24 sps:$4 sm:$0xff]   ;;  %v2368_v57 = vld [vmem:[#allocation5 + $0x270] ss:$24 sps:$4 sm:$0xff]   ;;  %v2370_v59 = vld [vmem:[#allocation5 + $0x2a4] ss:$24 sps:$4 sm:$0xff]  }
  0xcb   : > { %1089 = vmatprep.subr.bf16.mxu1 %v2318_v21  ;;  %1038 = vmatprep.mubr.bf16.mxu0 %v3124_v50  ;;  %v2369_v58 = vld [vmem:[#allocation5 + $0x278] ss:$24 sps:$4 sm:$0xff]   ;;  %v2372_v60 = vld [vmem:[#allocation5 + $0x2ac] ss:$24 sps:$4 sm:$0xff]   ;;  %v2375_v62 = vld [vmem:[#allocation5 + $0x2a8] ss:$24 sps:$4 sm:$0xff]  }
  0xcc   : > { %1111 = vmatprep.mubr.bf16.mxu1 %v3124_v50  ;;  %v2374_v61 = vld [vmem:[#allocation5 + $0x2a0] ss:$24 sps:$4 sm:$0xff]   ;;  %v2376_v63 = vld [vmem:[#allocation5 + $0x2d4] ss:$24 sps:$4 sm:$0xff]   ;;  %v2380_v1 = vld [vmem:[#allocation5 + $0x2d0] ss:$24 sps:$4 sm:$0xff]  }
  0xcd   : > { %1017 = vmatpush1.bf16.msra.mxu0 %v2320_v22  ;;  %v2378_v0 = vld [vmem:[#allocation5 + $0x2dc] ss:$24 sps:$4 sm:$0xff]   ;;  %v2381_v2 = vld [vmem:[#allocation5 + $0x2d8] ss:$24 sps:$4 sm:$0xff]   ;;  %v411_v5 = vld [vmem:[%s3102_s12 + $0x28] sm:$0xff]  ;;  %s3305_s5 = scalar_lea.vmem [#allocation12], %s3302_s15 }
  0xce   : > { %1090 = vmatpush1.bf16.msra.mxu1 %v2321_v23  ;;  %1018 = vmatprep.subr.bf16.mxu0 %v2322_v24  ;;  %v408_v4 = vld [vmem:[%s3102_s12 + $0x10] sm:$0xff]  ;;  %v413_v6 = vld [vmem:[%s3102_s12 + $0x38] sm:$0xff]  ;;  %v410_v12 = vld [vmem:[%s3102_s12 + $0x20] sm:$0xff]  ;;  %s3327_s8 = scalar_lea.vmem [#allocation10], %s3302_s15  ;;  %s3332_s14 = scalar_lea.vmem [#allocation9], %s3302_s15 }
  0xcf   : > { %1091 = vmatprep.subr.bf16.mxu1 %v2324_v25  ;;  %v2384_v7 = vld [vmem:[#allocation5 + $0x14] ss:$24 sps:$4 sm:$0xff]   ;;  %v3132_v8 = vpack.c.bf16 %v408_v4, %v406_v3  ;;  %v3134_v9 = vpack.c.bf16 %v413_v6, %v411_v5  ;;  %v2382_v10 = vld [vmem:[#allocation5 + $0x10] ss:$24 sps:$4 sm:$0xff]   ;;  %v2387_v11 = vld [vmem:[#allocation5 + $0x44] ss:$24 sps:$4 sm:$0xff]  }
  0xd0   : > { %v412_v13 = vld [vmem:[%s3102_s12 + $0x30] sm:$0xff]  ;;  %v415_v14 = vld [vmem:[%s3102_s12 + $0x48] sm:$0xff]  ;;  %v417_v15 = vld [vmem:[%s3102_s12 + $0x58] sm:$0xff]  ;;  %s3621_s13 = sld [smem:[#allocation20_spill]]  ;;  %s3622_s2 = sld [smem:[#allocation19_spill]] }
  0xd1   : > { %1019 = vmatpush1.bf16.msra.mxu0 %v2326_v26  ;;  %v2385_v16 = vld [vmem:[#allocation5 + $0x40] ss:$24 sps:$4 sm:$0xff]   ;;  %v2390_v17 = vld [vmem:[#allocation5 + $0x74] ss:$24 sps:$4 sm:$0xff]   ;;  %v3144_v18 = vpack.c.bf16 %v412_v13, %v410_v12  ;;  %v427_v19 = vpack.c.bf16 %v417_v15, %v415_v14  ;;  %v2388_v20 = vld [vmem:[#allocation5 + $0x70] ss:$24 sps:$4 sm:$0xff]  }
  0xd2   : > { %1092 = vmatpush1.bf16.msra.mxu1 %v2327_v27  ;;  %1020 = vmatprep.subr.bf16.mxu0 %v2328_v28  ;;  %v2393_v21 = vld [vmem:[#allocation5 + $0xa4] ss:$24 sps:$4 sm:$0xff]   ;;  %v416_v23 = vld [vmem:[%s3102_s12 + $0x50] sm:$0xff]  ;;  %v419_v24 = vld [vmem:[%s3102_s12 + $0x68] sm:$0xff]  ;;  %s1682_s20 = sshll.u32 %s3305_s5, 4  ;;  %s1644_s0 = sshll.u32 %s3332_s14, 4  ;;  %s3400_s20 = int_to_ptr.vmem [resolvable:$true] %s1682_s20  ;;  %s3426_s0 = int_to_ptr.vmem [resolvable:$true] %s1644_s0 }
  0xd3   : > { %1093 = vmatprep.subr.bf16.mxu1 %v2330_v29  ;;  %v414_v22 = vld [vmem:[%s3102_s12 + $0x40] sm:$0xff]  ;;  %v421_v25 = vld [vmem:[%s3102_s12 + $0x78] sm:$0xff]  ;;  %v2396_v27 = vld [vmem:[#allocation5 + $0xd4] ss:$24 sps:$4 sm:$0xff]   ;;  %s3627_s4 = sand.u32 1, %s2985_s17   ;;  %p3628_p3 = scmp.ne.s32.totalorder %s3605_s11, 0 }
  0xd4   : > { %v2391_v26 = vld [vmem:[#allocation5 + $0xa0] ss:$24 sps:$4 sm:$0xff]   ;;  %v3152_v28 = vpack.c.bf16 %v416_v23, %v414_v22  ;;  %v3154_v29 = vpack.c.bf16 %v421_v25, %v419_v24  ;;  %v2417_v46 = vld [vmem:[#allocation5 + $0x224] ss:$24 sps:$4 sm:$0xff]  }
  0xd5   : > { %1021 = vmatpush1.bf16.msra.mxu0 %v2332_v30  ;;  %v2394_v30 = vld [vmem:[#allocation5 + $0xd0] ss:$24 sps:$4 sm:$0xff]   ;;  %v2415_v47 = vld [vmem:[#allocation5 + $0x220] ss:$24 sps:$4 sm:$0xff]  }
  0xd6   : > { %1094 = vmatpush1.bf16.msra.mxu1 %v2333_v31  ;;  %1022 = vmatprep.subr.bf16.mxu0 %v2334_v32  ;;  %v2399_v31 = vld [vmem:[#allocation5 + $0x104] ss:$24 sps:$4 sm:$0xff]   ;;  %s2141_s26 = smul.u32 48, %s3621_s13  ;;  %s2105_s30 = sshll.u32 %s3622_s2, 4 }
  0xd7   : > { %1095 = vmatprep.subr.bf16.mxu1 %v2336_v33  ;;  %v418_v32 = vld [vmem:[%s3102_s12 + $0x60] sm:$0xff]  ;;  %v420_v33 = vld [vmem:[%s3102_s12 + $0x70] sm:$0xff]  ;;  %s1663_s12 = sshll.u32 %s3327_s8, 4  ;;  %s3624_s13 = sld [smem:[#allocation31_spill]]  ;;  %s3413_s12 = int_to_ptr.vmem [resolvable:$true] %s1663_s12 }
  0xd8   : > { %s1641_s28 = sadd.s32 %s2141_s26, %s2105_s30  ;;  %s2548_s9 = scalar_lea.vmem %s3413_s12, 1024 }
  0xd9   : > { %1023 = vmatpush1.bf16.msra.mxu0 %v2338_v34  ;;  %v2397_v34 = vld [vmem:[#allocation5 + $0x100] ss:$24 sps:$4 sm:$0xff]   ;;  %s2053_s1 = sshll.u32 %s1641_s28, 6  ;;  %s3625_s28 = sld [smem:[#allocation29_spill]] }
  0xda   : > { %1096 = vmatpush1.bf16.msra.mxu1 %v2339_v35  ;;  %1024 = vmatprep.subr.bf16.mxu0 %v2340_v36  ;;  %v2402_v35 = vld [vmem:[#allocation5 + $0x134] ss:$24 sps:$4 sm:$0xff]   ;;  %v3162_v36 = vpack.c.bf16 %v420_v33, %v418_v32  ;;  %p2549_p9 = scmp.ne.s32.totalorder %s3413_s12, %s2548_s9 }
  0xdb   : > { %1097 = vmatprep.subr.bf16.mxu1 %v2342_v37  ;;  %v2400_v37 = vld [vmem:[#allocation5 + $0x130] ss:$24 sps:$4 sm:$0xff]  }
  0xdc   : > { %p2550_p11 = pnand %p2549_p9, %p3628_p3 }
  0xdd   : > { %1025 = vmatpush1.bf16.msra.mxu0 %v2344_v38  ;;  %v2405_v38 = vld [vmem:[#allocation5 + $0x164] ss:$24 sps:$4 sm:$0xff]   ;;  %s3418_s2 = scalar_lea.hbm %s3624_s13, %s2053_s1 }
  0xde   : > { %1098 = vmatpush1.bf16.msra.mxu1 %v2345_v39  ;;  %1026 = vmatprep.subr.bf16.mxu0 %v2346_v40  ;;  %v2403_v39 = vld [vmem:[#allocation5 + $0x160] ss:$24 sps:$4 sm:$0xff]   ;;  %v2408_v40 = vld [vmem:[#allocation5 + $0x194] ss:$24 sps:$4 sm:$0xff]   ;;  %p2551_p0 = pneg %p2550_p11 }
  0xdf   : > { %1099 = vmatprep.subr.bf16.mxu1 %v2348_v41  ;;  %v2406_v41 = vld [vmem:[#allocation5 + $0x190] ss:$24 sps:$4 sm:$0xff]   ;;  %s3626_s10 = smov %s3625_s28  ;;  %s3424_s3 = scalar_lea.hbm %s3625_s28, %s2053_s1 }
  0xe1   : > { %1027 = vmatpush1.bf16.msra.mxu0 %v2350_v42  ;;  %v2411_v42 = vld [vmem:[#allocation5 + $0x1c4] ss:$24 sps:$4 sm:$0xff]  }
  0xe2   : > { %1100 = vmatpush1.bf16.msra.mxu1 %v2351_v43  ;;  %1028 = vmatprep.subr.bf16.mxu0 %v2352_v44  ;;  %v2409_v43 = vld [vmem:[#allocation5 + $0x1c0] ss:$24 sps:$4 sm:$0xff]   ;;  %v2414_v44 = vld [vmem:[#allocation5 + $0x1f4] ss:$24 sps:$4 sm:$0xff]  }
  0xe3   : > { %1101 = vmatprep.subr.bf16.mxu1 %v2354_v45  ;;  %v2412_v45 = vld [vmem:[#allocation5 + $0x1f0] ss:$24 sps:$4 sm:$0xff]  }
  0xe5   : > { %1029 = vmatpush1.bf16.msra.mxu0 %v2356_v48  ;;  %v2420_v48 = vld [vmem:[#allocation5 + $0x254] ss:$24 sps:$4 sm:$0xff]  }
  0xe6   : > { %1102 = vmatpush1.bf16.msra.mxu1 %v2357_v49  ;;  %1030 = vmatprep.subr.bf16.mxu0 %v2358_v51  ;;  %v2418_v49 = vld [vmem:[#allocation5 + $0x250] ss:$24 sps:$4 sm:$0xff]   ;;  %v2421_v51 = vld [vmem:[#allocation5 + $0x280] ss:$24 sps:$4 sm:$0xff]  }
  0xe7   : > { %1103 = vmatprep.subr.bf16.mxu1 %v2360_v52  ;;  %v2426_v52 = vld [vmem:[#allocation5 + $0x2b4] ss:$24 sps:$4 sm:$0xff]  }
  0xe9   : > { %1031 = vmatpush1.bf16.msra.mxu0 %v2362_v53  ;;  %v2424_v53 = vld [vmem:[#allocation5 + $0x2b0] ss:$24 sps:$4 sm:$0xff]  }
  0xea   : > { %1104 = vmatpush1.bf16.msra.mxu1 %v2363_v54  ;;  %1032 = vmatprep.subr.bf16.mxu0 %v2364_v55  ;;  %v2429_v54 = vld [vmem:[#allocation5 + $0x2e4] ss:$24 sps:$4 sm:$0xff]   ;;  %v2427_v55 = vld [vmem:[#allocation5 + $0x2e0] ss:$24 sps:$4 sm:$0xff]  }
  0xeb   : > { %1105 = vmatprep.subr.bf16.mxu1 %v2366_v56 }
  0xed   : > { %1033 = vmatpush1.bf16.msra.mxu0 %v2368_v57 }
  0xee   : > { %1106 = vmatpush1.bf16.msra.mxu1 %v2369_v58  ;;  %1034 = vmatprep.subr.bf16.mxu0 %v2370_v59 }
  0xef   : > { %1107 = vmatprep.subr.bf16.mxu1 %v2372_v60 }
  0xf1   : > { %1035 = vmatpush1.bf16.msra.mxu0 %v2374_v61 }
  0xf2   : > { %1108 = vmatpush1.bf16.msra.mxu1 %v2375_v62  ;;  %1036 = vmatprep.subr.bf16.mxu0 %v2376_v63 }
  0xf3   : > { %1109 = vmatprep.subr.bf16.mxu1 %v2378_v0 }
  0xf5   : > { %1037 = vmatpush1.bf16.msra.mxu0 %v2380_v1 }
  0xf6   : > { %1110 = vmatpush1.bf16.msra.mxu1 %v2381_v2  ;;  %1152 = vmatprep.subr.bf16.mxu0 %v2384_v7 }
  0xf7   : > { %2108 = vmatprep.subr.bf16.mxu1 %v2384_v7 }
  0xf8   : > { %1039 = vmatmul.mubr.bf16.vlgmr.msra.gmra.mrb[0].mxu0 %v3132_v8 }
  0xf9   : > { %1112 = vmatmul.mubr.bf16.vlgmr.msra.gmra.mrb[0].mxu1 %v3132_v8  ;;  %1048 = vmatprep.mubr.bf16.mxu0 %v3134_v9 }
  0xfa   : > { %1121 = vmatprep.mubr.bf16.mxu1 %v3134_v9  ;;  %1153 = vmatpush1.bf16.msra.mxu0 %v2382_v10 }
  0xfb   : > { %2124 = vmatpush1.bf16.msra.mxu1 %v2382_v10  ;;  %1154 = vmatprep.subr.bf16.mxu0 %v2387_v11 }
  0xfc   : > { %2109 = vmatprep.subr.bf16.mxu1 %v2387_v11 }
  0xfe   : > { %1155 = vmatpush1.bf16.msra.mxu0 %v2385_v16 }
  0xff   : > { %2125 = vmatpush1.bf16.msra.mxu1 %v2385_v16  ;;  %1156 = vmatprep.subr.bf16.mxu0 %v2390_v17 }
 0x100   : > { %2110 = vmatprep.subr.bf16.mxu1 %v2390_v17  ;;  %1049 = vmatmul.mubr.bf16.gmra.mrb[4].mxu0 %v3144_v18 }
 0x101   : > { %1122 = vmatmul.mubr.bf16.gmra.mrb[4].mxu1 %v3144_v18  ;;  %1058 = vmatprep.mubr.bf16.mxu0 %v427_v19 }
 0x102   : > { %1131 = vmatprep.mubr.bf16.mxu1 %v427_v19  ;;  %1157 = vmatpush1.bf16.msra.mxu0 %v2388_v20 }
 0x103   : > { %2126 = vmatpush1.bf16.msra.mxu1 %v2388_v20  ;;  %1158 = vmatprep.subr.bf16.mxu0 %v2393_v21 }
 0x104   : > { %2111 = vmatprep.subr.bf16.mxu1 %v2393_v21 }
 0x106   : > { %1159 = vmatpush1.bf16.msra.mxu0 %v2391_v26 }
 0x107   : > { %2127 = vmatpush1.bf16.msra.mxu1 %v2391_v26  ;;  %1160 = vmatprep.subr.bf16.mxu0 %v2396_v27 }
 0x108   : > { %2112 = vmatprep.subr.bf16.mxu1 %v2396_v27  ;;  %1059 = vmatmul.mubr.bf16.gmra.mrb[8].mxu0 %v3152_v28 }
 0x109   : > { %1132 = vmatmul.mubr.bf16.gmra.mrb[8].mxu1 %v3152_v28  ;;  %1068 = vmatprep.mubr.bf16.mxu0 %v3154_v29 }
 0x10a   : > { %1141 = vmatprep.mubr.bf16.mxu1 %v3154_v29  ;;  %1161 = vmatpush1.bf16.msra.mxu0 %v2394_v30 }
 0x10b   : > { %2128 = vmatpush1.bf16.msra.mxu1 %v2394_v30  ;;  %1162 = vmatprep.subr.bf16.mxu0 %v2399_v31 }
 0x10c   : > { %2113 = vmatprep.subr.bf16.mxu1 %v2399_v31 }
 0x10e   : > { %1163 = vmatpush1.bf16.msra.mxu0 %v2397_v34 }
 0x10f   : > { %2129 = vmatpush1.bf16.msra.mxu1 %v2397_v34  ;;  %1164 = vmatprep.subr.bf16.mxu0 %v2402_v35 }
 0x110   : > { %2114 = vmatprep.subr.bf16.mxu1 %v2402_v35  ;;  %1069 = vmatmul.mubr.bf16.gmra.mrb[12].mxu0 %v3162_v36 }
 0x111   : > { %1142 = vmatmul.mubr.bf16.gmra.mrb[12].mxu1 %v3162_v36  ;;  %1184 = vmatprep.mubr.bf16.mxu0 %v3124_v50  ;;  %v2423_v50 = vld [vmem:[#allocation5 + $0x284] ss:$24 sps:$4 sm:$0xff]  }
 0x112   : > { %1204 = vmatprep.mubr.bf16.mxu1 %v427_v19  ;;  %1165 = vmatpush1.bf16.msra.mxu0 %v2400_v37 }
 0x113   : > { %2130 = vmatpush1.bf16.msra.mxu1 %v2400_v37  ;;  %1166 = vmatprep.subr.bf16.mxu0 %v2405_v38 }
 0x114   : > { %2115 = vmatprep.subr.bf16.mxu1 %v2405_v38 }
 0x116   : > { %1167 = vmatpush1.bf16.msra.mxu0 %v2403_v39 }
 0x117   : > { %2131 = vmatpush1.bf16.msra.mxu1 %v2403_v39  ;;  %1168 = vmatprep.subr.bf16.mxu0 %v2408_v40 }
 0x118   : > { %2116 = vmatprep.subr.bf16.mxu1 %v2408_v40 }
 0x11a   : > { %1169 = vmatpush1.bf16.msra.mxu0 %v2406_v41 }
 0x11b   : > { %2132 = vmatpush1.bf16.msra.mxu1 %v2406_v41  ;;  %1170 = vmatprep.subr.bf16.mxu0 %v2411_v42 }
 0x11c   : > { %2117 = vmatprep.subr.bf16.mxu1 %v2411_v42 }
 0x11e   : > { %1171 = vmatpush1.bf16.msra.mxu0 %v2409_v43 }
 0x11f   : > { %2133 = vmatpush1.bf16.msra.mxu1 %v2409_v43  ;;  %1172 = vmatprep.subr.bf16.mxu0 %v2414_v44 }
 0x120   : > { %2118 = vmatprep.subr.bf16.mxu1 %v2414_v44 }
 0x122   : > { %1173 = vmatpush1.bf16.msra.mxu0 %v2412_v45 }
 0x123   : > { %2134 = vmatpush1.bf16.msra.mxu1 %v2412_v45  ;;  %1174 = vmatprep.subr.bf16.mxu0 %v2417_v46 }
 0x124   : > { %2119 = vmatprep.subr.bf16.mxu1 %v2417_v46 }
 0x126   : > { %1175 = vmatpush1.bf16.msra.mxu0 %v2415_v47 }
 0x127   : > { %2135 = vmatpush1.bf16.msra.mxu1 %v2415_v47  ;;  %1176 = vmatprep.subr.bf16.mxu0 %v2420_v48 }
 0x128   : > { %2120 = vmatprep.subr.bf16.mxu1 %v2420_v48  ;;  %v1233_v48 = vld [vmem:[%s3316_s6] sm:$0xff] }
 0x12a   : > { %1177 = vmatpush1.bf16.msra.mxu0 %v2418_v49 }
 0x12b   : > { %2136 = vmatpush1.bf16.msra.mxu1 %v2418_v49  ;;  %1178 = vmatprep.subr.bf16.mxu0 %v2423_v50  ;;  %v1225_v49 = vld [vmem:[%s3116_s18] sm:$0xff] }
 0x12c   : > { %2121 = vmatprep.subr.bf16.mxu1 %v2423_v50  ;;  %v1226_v50 = vld [vmem:[%s3116_s18 + $0x8] sm:$0xff] }
 0x12e   : > { %1179 = vmatpush1.bf16.msra.mxu0 %v2421_v51 }
 0x12f   : > { %2137 = vmatpush1.bf16.msra.mxu1 %v2421_v51  ;;  %1180 = vmatprep.subr.bf16.mxu0 %v2426_v52 }
 0x130   : > { %2122 = vmatprep.subr.bf16.mxu1 %v2426_v52  ;;  %v1234_v52 = vld [vmem:[%s3316_s6 + $0x8] sm:$0xff] }
 0x132   : > { %1181 = vmatpush1.bf16.msra.mxu0 %v2424_v53 }
 0x133   : > { %2138 = vmatpush1.bf16.msra.mxu1 %v2424_v53  ;;  %1182 = vmatprep.subr.bf16.mxu0 %v2429_v54 }
 0x134   : > { %2123 = vmatprep.subr.bf16.mxu1 %v2429_v54 }
 0x136   : > { %1183 = vmatpush1.bf16.msra.mxu0 %v2427_v55 }
 0x137   : > { %2139 = vmatpush1.bf16.msra.mxu1 %v2427_v55 }
 0x139   : > { %1185 = vmatmul.mubr.bf16.vlgmr.msra.gmra.mrb[16].mxu0 %v3132_v8 }
 0x13a   : > { %1205 = vmatmul.mubr.bf16.vlgmr.msra.gmra.mrb[16].mxu1 %v3152_v28  ;;  %1194 = vmatprep.mubr.bf16.mxu0 %v3134_v9 }
 0x13b   : > { %1214 = vmatprep.mubr.bf16.mxu1 %v3154_v29 }
 0x141   : > { %1195 = vmatmul.mubr.bf16.gmra.mrb[20].mxu0 %v3144_v18 }
 0x142   : > { %1215 = vmatmul.mubr.bf16.gmra.mrb[20].mxu1 %v3162_v36 }
 0x1cb   : > { %v3173_v56 = vpop.f32.mrb[0].mxu0 }
 0x1cc   : > { %v3175_v57 = vpop.f32.mrb[0].mxu1  ;;  %v3179_v58 = vpop.f32.mrb[1].mxu0 }
 0x1cd   : > { %1329 = vrot.lane.b32.xlu0 %v3175_v57, %s2750_s19  ;;  %v3181_v59 = vpop.f32.mrb[1].mxu1  ;;  %v3183_v60 = vpop.f32.mrb[2].mxu0  ;;  %v1321_v53 = vmul.f32 %v1225_v49, %v3175_v57 }
 0x1ce   : > { %v3185_v61 = vpop.f32.mrb[2].mxu1  ;;  %1251 = vrot.lane.b32.xlu1 %v3183_v60, %s2750_s19  ;;  %v3191_v63 = vpop.f32.mrb[3].mxu0 }
 0x1cf   : > { %v3187_v62 = vpop.f32.mrb[3].mxu1 }
 0x1d1   : > { %1249 = vrot.lane.b32.xlu0 %v3173_v56, %s2750_s19 }
 0x1d2   : > { %1491 = vrot.lane.b32.xlu1 %v3187_v62, %s2750_s19 }
 0x1d3   : > { %v3199_v1 = vpop.f32.mrb[4].mxu0 }
 0x1d4   : > { %v3197_v0 = vpop.f32.mrb[4].mxu1  ;;  %v3205_v3 = vpop.f32.mrb[5].mxu0 }
 0x1d5   : > { %1489 = vrot.lane.b32.xlu0 %v3181_v59, %s2750_s19  ;;  %v3203_v2 = vpop.f32.mrb[5].mxu1  ;;  %v3209_v5 = vpop.f32.mrb[6].mxu0 }
 0x1d6   : > { %v3207_v4 = vpop.f32.mrb[6].mxu1  ;;  %1411 = vrot.lane.b32.xlu1 %v3191_v63, %s2750_s19  ;;  %v3215_v7 = vpop.f32.mrb[7].mxu0 }
 0x1d7   : > { %v3213_v6 = vpop.f32.mrb[7].mxu1 }
 0x1d9   : > { %1409 = vrot.lane.b32.xlu0 %v3179_v58, %s2750_s19 }
 0x1da   : > { %1333 = vrot.lane.b32.xlu1 %v3197_v0, %s2750_s19 }
 0x1db   : > { %v3223_v9 = vpop.f32.mrb[8].mxu0 }
 0x1dc   : > { %v3221_v8 = vpop.f32.mrb[8].mxu1  ;;  %v3229_v11 = vpop.f32.mrb[9].mxu0 }
 0x1dd   : > { %1331 = vrot.lane.b32.xlu0 %v3185_v61, %s2750_s19  ;;  %v3227_v10 = vpop.f32.mrb[9].mxu1  ;;  %v3233_v13 = vpop.f32.mrb[10].mxu0 }
 0x1de   : > { %v3231_v12 = vpop.f32.mrb[10].mxu1  ;;  %1335 = vrot.lane.b32.xlu1 %v3207_v4, %s2750_s19  ;;  %v3239_v15 = vpop.f32.mrb[11].mxu0 }
 0x1df   : > { %v3237_v14 = vpop.f32.mrb[11].mxu1 }
 0x1e1   : > { %1253 = vrot.lane.b32.xlu0 %v3199_v1, %s2750_s19 }
 0x1e2   : > { %1255 = vrot.lane.b32.xlu1 %v3209_v5, %s2750_s19 }
 0x1e3   : > { %v3247_v17 = vpop.f32.mrb[12].mxu0 }
 0x1e4   : > { %v3245_v16 = vpop.f32.mrb[12].mxu1  ;;  %v3253_v19 = vpop.f32.mrb[13].mxu0 }
 0x1e5   : > { %1493 = vrot.lane.b32.xlu0 %v3203_v2, %s2750_s19  ;;  %v3251_v18 = vpop.f32.mrb[13].mxu1  ;;  %v3257_v21 = vpop.f32.mrb[14].mxu0 }
 0x1e6   : > { %v3255_v20 = vpop.f32.mrb[14].mxu1  ;;  %1495 = vrot.lane.b32.xlu1 %v3213_v6, %s2750_s19  ;;  %v3263_v23 = vpop.f32.mrb[15].mxu0 }
 0x1e7   : > { %v3261_v22 = vpop.f32.mrb[15].mxu1 }
 0x1e9   : > { %1413 = vrot.lane.b32.xlu0 %v3205_v3, %s2750_s19 }
 0x1ea   : > { %1415 = vrot.lane.b32.xlu1 %v3215_v7, %s2750_s19 }
 0x1ed   : > { %1337 = vrot.lane.b32.xlu0 %v3221_v8, %s2750_s19 }
 0x1ee   : > { %1339 = vrot.lane.b32.xlu1 %v3231_v12, %s2750_s19 }
 0x1f1   : > { %1257 = vrot.lane.b32.xlu0 %v3223_v9, %s2750_s19 }
 0x1f2   : > { %1259 = vrot.lane.b32.xlu1 %v3233_v13, %s2750_s19 }
 0x1f5   : > { %1497 = vrot.lane.b32.xlu0 %v3227_v10, %s2750_s19 }
 0x1f6   : > { %1499 = vrot.lane.b32.xlu1 %v3237_v14, %s2750_s19 }
 0x1f9   : > { %1417 = vrot.lane.b32.xlu0 %v3229_v11, %s2750_s19 }
 0x1fa   : > { %1419 = vrot.lane.b32.xlu1 %v3239_v15, %s2750_s19 }
 0x1fd   : > { %1341 = vrot.lane.b32.xlu0 %v3245_v16, %s2750_s19 }
 0x1fe   : > { %1343 = vrot.lane.b32.xlu1 %v3255_v20, %s2750_s19 }
 0x201   : > { %1261 = vrot.lane.b32.xlu0 %v3247_v17, %s2750_s19 }
 0x202   : > { %1263 = vrot.lane.b32.xlu1 %v3257_v21, %s2750_s19 }
 0x205   : > { %1501 = vrot.lane.b32.xlu0 %v3251_v18, %s2750_s19 }
 0x206   : > { %1503 = vrot.lane.b32.xlu1 %v3261_v22, %s2750_s19 }
 0x209   : > { %1421 = vrot.lane.b32.xlu0 %v3253_v19, %s2750_s19 }
 0x20a   : > { %1423 = vrot.lane.b32.xlu1 %v3263_v23, %s2750_s19  ;;  %s3623_s19 = sld [smem:[#allocation30_spill]] }
 0x20c   : > { %v1186_v25 = vpop.f32.mrb[16].mxu0 }
 0x20d   : > { %v1206_v24 = vpop.f32.mrb[16].mxu1  ;;  %v1188_v26 = vpop.f32.mrb[17].mxu0 }
 0x20e   : > { %v1208_v27 = vpop.f32.mrb[17].mxu1  ;;  %v2097_v28 = vpack.c.bf16 %v1188_v26, %v1186_v25  ;;  %v1190_v31 = vpop.f32.mrb[18].mxu0 }
 0x20f   : > { %v2101_v29 = vpack.c.bf16 %v1208_v27, %v1206_v24  ;;  %v1210_v30 = vpop.f32.mrb[18].mxu1  ;;  %v1192_v32 = vpop.f32.mrb[19].mxu0  ;;  %v1242_v24 = vmul.f32 %v1226_v50, %v3183_v60 }
 0x210   : > { %v1212_v33 = vpop.f32.mrb[19].mxu1  ;;  %1609 = vst [vmem:[%s3305_s5] sm:$0xff] %v2097_v28  ;;  %v2098_v34 = vpack.c.bf16 %v1192_v32, %v1190_v31  ;;  %v1241_v28 = vmul.f32 %v1225_v49, %v3173_v56  ;;  %s3411_s15 = scalar_lea.hbm %s3623_s19, %s2053_s1 }
 0x211   : > { %1613 = vst [vmem:[%s3305_s5 + $0x20] sm:$0xff] %v2101_v29  ;;  %v2102_v35 = vpack.c.bf16 %v1212_v33, %v1210_v30  ;;  %v1482_v33 = vmul.f32 %v1226_v50, %v3187_v62 }
 0x212   : > { %1610 = vst [vmem:[%s3305_s5 + $0x8] sm:$0xff] %v2098_v34 }
 0x213   : > { %1614 = vst [vmem:[%s3305_s5 + $0x28] sm:$0xff] %v2102_v35 }
 0x214   : > { %v1196_v37 = vpop.f32.mrb[20].mxu0 }
 0x215   : > { %v1216_v36 = vpop.f32.mrb[20].mxu1  ;;  %v1198_v38 = vpop.f32.mrb[21].mxu0 }
 0x216   : > { %v1218_v39 = vpop.f32.mrb[21].mxu1  ;;  %v2099_v40 = vpack.c.bf16 %v1198_v38, %v1196_v37  ;;  %v1200_v43 = vpop.f32.mrb[22].mxu0 }
 0x217   : > { %v2103_v41 = vpack.c.bf16 %v1218_v39, %v1216_v36  ;;  %v1220_v42 = vpop.f32.mrb[22].mxu1  ;;  %v1202_v44 = vpop.f32.mrb[23].mxu0  ;;  %v1481_v36 = vmul.f32 %v1225_v49, %v3181_v59  ;;  %v1402_v39 = vmul.f32 %v1226_v50, %v3191_v63 }
 0x218   : > { %v1222_v45 = vpop.f32.mrb[23].mxu1  ;;  %1611 = vst [vmem:[%s3305_s5 + $0x10] sm:$0xff] %v2099_v40  ;;  %v2100_v46 = vpack.c.bf16 %v1202_v44, %v1200_v43  ;;  %v1227_v43 = vld [vmem:[%s3116_s18 + $0x10] sm:$0xff] }
 0x219   : > { %1615 = vst [vmem:[%s3305_s5 + $0x30] sm:$0xff] %v2103_v41  ;;  %v2104_v47 = vpack.c.bf16 %v1222_v45, %v1220_v42  ;;  %v1235_v44 = vld [vmem:[%s3316_s6 + $0x10] sm:$0xff]  ;;  %v1401_v45 = vmul.f32 %v1225_v49, %v3179_v58  ;;  %v1323_v63 = vmul.f32 %v1227_v43, %v3197_v0 }
 0x21a   : > { %1612 = vst [vmem:[%s3305_s5 + $0x18] sm:$0xff] %v2100_v46 }
 0x21b   : > { %1616 = vst [vmem:[%s3305_s5 + $0x38] sm:$0xff] %v2104_v47  ;;  %s2751_s5 = smov [#allocation10]  }
 0x23f   : > { %v1330_v51 = vpop.permute.xlu0 %1329 }
 0x240   : > { %v1345_v54 = vmul.f32 %v1330_v51, %v1233_v48  ;;  %v1252_v55 = vpop.permute.xlu1 %1251 }
 0x241   : > { %v1266_v26 = vmul.f32 %v1252_v55, %v1234_v52 }
 0x242   : > { %v1353_v25 = vadd.f32 %v1345_v54, %v1321_v53 }
 0x243   : > { %v1250_v27 = vpop.permute.xlu0 %1249  ;;  %v1274_v30 = vadd.f32 %v1266_v26, %v1242_v24 }
 0x244   : > { %v2073_v29 = vpack.c.bf16 %v1353_v25, %v1353_v25  ;;  %v1265_v31 = vmul.f32 %v1250_v27, %v1233_v48  ;;  %v1492_v32 = vpop.permute.xlu1 %1491  ;;  %v1228_v25 = vld [vmem:[%s3116_s18 + $0x18] sm:$0xff] }
 0x245   : > { %v2066_v57 = vpack.c.bf16 %v1274_v30, %v1274_v30  ;;  %v1506_v60 = vmul.f32 %v1492_v32, %v1234_v52  ;;  %v1236_v27 = vld [vmem:[%s3316_s6 + $0x18] sm:$0xff]  ;;  %v1324_v30 = vmul.f32 %v1228_v25, %v3207_v4 }
 0x246   : > { %1393 = vst [vmem:[%s3327_s8] sm:$0xf] %v2073_v29  ;;  %v1273_v34 = vadd.f32 %v1265_v31, %v1241_v28  ;;  %v1322_v28 = vmul.f32 %v1226_v50, %v3185_v61 }
 0x247   : > { %v1490_v35 = vpop.permute.xlu0 %1489  ;;  %1314 = vst [vmem:[%s3332_s14 + $0x8] sm:$0xf] %v2066_v57  ;;  %v1514_v62 = vadd.f32 %v1506_v60, %v1482_v33  ;;  %v1243_v57 = vmul.f32 %v1227_v43, %v3199_v1 }
 0x248   : > { %v2065_v56 = vpack.c.bf16 %v1273_v34, %v1273_v34  ;;  %v1505_v37 = vmul.f32 %v1490_v35, %v1233_v48  ;;  %v1412_v38 = vpop.permute.xlu1 %1411  ;;  %v1244_v35 = vmul.f32 %v1228_v25, %v3209_v5 }
 0x249   : > { %v2090_v40 = vpack.c.bf16 %v1514_v62, %v1514_v62  ;;  %v1426_v42 = vmul.f32 %v1412_v38, %v1234_v52  ;;  %v1483_v62 = vmul.f32 %v1227_v43, %v3203_v2 }
 0x24a   : > { %1313 = vst [vmem:[%s3332_s14] sm:$0xf] %v2065_v56  ;;  %v1513_v41 = vadd.f32 %v1505_v37, %v1481_v36 }
 0x24b   : > { %v1410_v59 = vpop.permute.xlu0 %1409  ;;  %1554 = vst [vmem:[%s3327_s8 + $0xc] sm:$0xf] %v2090_v40  ;;  %v1434_v47 = vadd.f32 %v1426_v42, %v1402_v39  ;;  %v1484_v40 = vmul.f32 %v1228_v25, %v3213_v6  ;;  %v1404_v6 = vmul.f32 %v1228_v25, %v3215_v7 }
 0x24c   : > { %v2089_v46 = vpack.c.bf16 %v1513_v41, %v1513_v41  ;;  %v1425_v51 = vmul.f32 %v1410_v59, %v1233_v48  ;;  %v1334_v53 = vpop.permute.xlu1 %1333 }
 0x24d   : > { %v2082_v54 = vpack.c.bf16 %v1434_v47, %v1434_v47  ;;  %v1347_v24 = vmul.f32 %v1334_v53, %v1235_v44 }
 0x24e   : > { %1553 = vst [vmem:[%s3327_s8 + $0x4] sm:$0xf] %v2089_v46  ;;  %v1433_v55 = vadd.f32 %v1425_v51, %v1401_v45  ;;  %v1403_v45 = vmul.f32 %v1227_v43, %v3205_v3  ;;  %v1229_v51 = vld [vmem:[%s3116_s18 + $0x20] sm:$0xff] }
 0x24f   : > { %v1332_v26 = vpop.permute.xlu0 %1331  ;;  %1474 = vst [vmem:[%s3332_s14 + $0xc] sm:$0xf] %v2082_v54  ;;  %v1355_v49 = vadd.f32 %v1347_v24, %v1323_v63  ;;  %v1237_v63 = vld [vmem:[%s3316_s6 + $0x20] sm:$0xff]  ;;  %v1325_v3 = vmul.f32 %v1229_v51, %v3221_v8 }
 0x250   : > { %v2081_v58 = vpack.c.bf16 %v1433_v55, %v1433_v55  ;;  %v1346_v29 = vmul.f32 %v1332_v26, %v1234_v52  ;;  %v1336_v48 = vpop.permute.xlu1 %1335  ;;  %v1230_v26 = vld [vmem:[%s3116_s18 + $0x28] sm:$0xff] }
 0x251   : > { %v2075_v0 = vpack.c.bf16 %v1355_v49, %v1355_v49  ;;  %v1348_v32 = vmul.f32 %v1336_v48, %v1236_v27  ;;  %v1326_v48 = vmul.f32 %v1230_v26, %v3231_v12 }
 0x252   : > { %1473 = vst [vmem:[%s3332_s14 + $0x4] sm:$0xf] %v2081_v58  ;;  %v1354_v31 = vadd.f32 %v1346_v29, %v1322_v28  ;;  %v1238_v58 = vld [vmem:[%s3316_s6 + $0x28] sm:$0xff] }
 0x253   : > { %v1254_v33 = vpop.permute.xlu0 %1253  ;;  %1395 = vst [vmem:[%s3327_s8 + $0x10] sm:$0xf] %v2075_v0  ;;  %v1356_v60 = vadd.f32 %v1348_v32, %v1324_v30  ;;  %v1245_v0 = vmul.f32 %v1229_v51, %v3223_v9 }
 0x254   : > { %v2074_v34 = vpack.c.bf16 %v1354_v31, %v1354_v31  ;;  %v1267_v61 = vmul.f32 %v1254_v33, %v1235_v44  ;;  %v1256_v50 = vpop.permute.xlu1 %1255 }
 0x255   : > { %v2076_v52 = vpack.c.bf16 %v1356_v60, %v1356_v60  ;;  %v1268_v4 = vmul.f32 %v1256_v50, %v1236_v27  ;;  %v1485_v50 = vmul.f32 %v1229_v51, %v3227_v10 }
 0x256   : > { %1394 = vst [vmem:[%s3327_s8 + $0x8] sm:$0xf] %v2074_v34  ;;  %v1275_v36 = vadd.f32 %v1267_v61, %v1243_v57  ;;  %v1246_v57 = vmul.f32 %v1230_v26, %v3233_v13 }
 0x257   : > { %v1494_v56 = vpop.permute.xlu0 %1493  ;;  %1396 = vst [vmem:[%s3327_s8 + $0x18] sm:$0xf] %v2076_v52  ;;  %v1276_v1 = vadd.f32 %v1268_v4, %v1244_v35  ;;  %v1486_v4 = vmul.f32 %v1230_v26, %v3237_v14  ;;  %v1406_v14 = vmul.f32 %v1230_v26, %v3239_v15 }
 0x258   : > { %v2067_v37 = vpack.c.bf16 %v1275_v36, %v1275_v36  ;;  %v1507_v38 = vmul.f32 %v1494_v56, %v1235_v44  ;;  %v1496_v39 = vpop.permute.xlu1 %1495 }
 0x259   : > { %v2068_v5 = vpack.c.bf16 %v1276_v1, %v1276_v1  ;;  %v1508_v42 = vmul.f32 %v1496_v39, %v1236_v27  ;;  %v1405_v1 = vmul.f32 %v1229_v51, %v3229_v11 }
 0x25a   : > { %1315 = vst [vmem:[%s3332_s14 + $0x10] sm:$0xf] %v2067_v37  ;;  %v1515_v41 = vadd.f32 %v1507_v38, %v1483_v62 }
 0x25b   : > { %v1414_v59 = vpop.permute.xlu0 %1413  ;;  %1316 = vst [vmem:[%s3332_s14 + $0x18] sm:$0xf] %v2068_v5  ;;  %v1516_v46 = vadd.f32 %v1508_v42, %v1484_v40  ;;  %v1231_v40 = vld [vmem:[%s3116_s18 + $0x30] sm:$0xff] }
 0x25c   : > { %v2091_v2 = vpack.c.bf16 %v1515_v41, %v1515_v41  ;;  %v1427_v47 = vmul.f32 %v1414_v59, %v1235_v44  ;;  %v1416_v53 = vpop.permute.xlu1 %1415  ;;  %v1239_v41 = vld [vmem:[%s3316_s6 + $0x30] sm:$0xff]  ;;  %v1327_v11 = vmul.f32 %v1231_v40, %v3245_v16 }
 0x25d   : > { %v2092_v54 = vpack.c.bf16 %v1516_v46, %v1516_v46  ;;  %v1428_v24 = vmul.f32 %v1416_v53, %v1236_v27 }
 0x25e   : > { %1555 = vst [vmem:[%s3327_s8 + $0x14] sm:$0xf] %v2091_v2  ;;  %v1435_v55 = vadd.f32 %v1427_v47, %v1403_v45  ;;  %v1232_v2 = vld [vmem:[%s3116_s18 + $0x38] sm:$0xff]  ;;  %s3430_s18 = scalar_lea.sflag [#allocation11], %s3627_s4 }
 0x25f   : > { %v1338_v28 = vpop.permute.xlu0 %1337  ;;  %1556 = vst [vmem:[%s3327_s8 + $0x1c] sm:$0xf] %v2092_v54  ;;  %v1436_v49 = vadd.f32 %v1428_v24, %v1404_v6  ;;  %v1240_v47 = vld [vmem:[%s3316_s6 + $0x38] sm:$0xff]  ;;  %v1328_v15 = vmul.f32 %v1232_v2, %v3255_v20  ;;  %s2552_s6 = sshll.u32 %s2751_s5, 4  ;;  %s2553_s6 = int_to_ptr.vmem [resolvable:$false] %s2552_s6 }
 0x260   : > { %v2083_v43 = vpack.c.bf16 %v1435_v55, %v1435_v55  ;;  %v1349_v44 = vmul.f32 %v1338_v28, %v1237_v63  ;;  %v1340_v29 = vpop.permute.xlu1 %1339  ;;  %v1247_v28 = vmul.f32 %v1231_v40, %v3247_v17  ;;  %v1487_v17 = vmul.f32 %v1231_v40, %v3251_v18  ;;  %p2555_p13 = scmp.lt.s32.totalorder %s3413_s12, %s2553_s6 }
 0x261   : > { %v2084_v7 = vpack.c.bf16 %v1436_v49, %v1436_v49  ;;  %v1350_v30 = vmul.f32 %v1340_v29, %v1238_v58  ;;  %v1248_v49 = vmul.f32 %v1232_v2, %v3257_v21  ;;  %v1407_v18 = vmul.f32 %v1231_v40, %v3253_v19 }
 0x262   : > { %1475 = vst [vmem:[%s3332_s14 + $0x14] sm:$0xf] %v2083_v43  ;;  %v1357_v25 = vadd.f32 %v1349_v44, %v1325_v3 }
 0x263   : > { %v1258_v27 = vpop.permute.xlu0 %1257  ;;  %1476 = vst [vmem:[%s3332_s14 + $0x1c] sm:$0xf] %v2084_v7  ;;  %v1358_v32 = vadd.f32 %v1350_v30, %v1326_v48 }
 0x264   : > { %v2077_v31 = vpack.c.bf16 %v1357_v25, %v1357_v25  ;;  %v1269_v8 = vmul.f32 %v1258_v27, %v1237_v63  ;;  %v1260_v33 = vpop.permute.xlu1 %1259 }
 0x265   : > { %v2078_v34 = vpack.c.bf16 %v1358_v32, %v1358_v32  ;;  %v1270_v12 = vmul.f32 %v1260_v33, %v1238_v58 }
 0x266   : > { %1397 = vst [vmem:[%s3327_s8 + $0x20] sm:$0xf] %v2077_v31  ;;  %v1277_v60 = vadd.f32 %v1269_v8, %v1245_v0  ;;  %v1488_v0 = vmul.f32 %v1232_v2, %v3261_v22  ;;  %v1408_v22 = vmul.f32 %v1232_v2, %v3263_v23 }
 0x267   : > { %v1498_v61 = vpop.permute.xlu0 %1497  ;;  %1398 = vst [vmem:[%s3327_s8 + $0x28] sm:$0xf] %v2078_v34  ;;  %v1278_v9 = vadd.f32 %v1270_v12, %v1246_v57 }
 0x268   : > { %v2069_v35 = vpack.c.bf16 %v1277_v60, %v1277_v60  ;;  %v1509_v52 = vmul.f32 %v1498_v61, %v1237_v63  ;;  %v1500_v36 = vpop.permute.xlu1 %1499 }
 0x269   : > { %v2070_v13 = vpack.c.bf16 %v1278_v9, %v1278_v9  ;;  %v1510_v62 = vmul.f32 %v1500_v36, %v1238_v58 }
 0x26a   : > { %1317 = vst [vmem:[%s3332_s14 + $0x20] sm:$0xf] %v2069_v35  ;;  %v1517_v56 = vadd.f32 %v1509_v52, %v1485_v50 }
 0x26b   : > { %v1418_v37 = vpop.permute.xlu0 %1417  ;;  %1318 = vst [vmem:[%s3332_s14 + $0x28] sm:$0xf] %v2070_v13  ;;  %v1518_v38 = vadd.f32 %v1510_v62, %v1486_v4 }
 0x26c   : > { %v2093_v10 = vpack.c.bf16 %v1517_v56, %v1517_v56  ;;  %v1429_v39 = vmul.f32 %v1418_v37, %v1237_v63  ;;  %v1420_v5 = vpop.permute.xlu1 %1419 }
 0x26d   : > { %v2094_v42 = vpack.c.bf16 %v1518_v38, %v1518_v38  ;;  %v1430_v45 = vmul.f32 %v1420_v5, %v1238_v58 }
 0x26e   : > { %1557 = vst [vmem:[%s3327_s8 + $0x24] sm:$0xf] %v2093_v10  ;;  %v1437_v59 = vadd.f32 %v1429_v39, %v1405_v1 }
 0x26f   : > { %v1342_v46 = vpop.permute.xlu0 %1341  ;;  %1558 = vst [vmem:[%s3327_s8 + $0x2c] sm:$0xf] %v2094_v42  ;;  %v1438_v53 = vadd.f32 %v1430_v45, %v1406_v14 }
 0x270   : > { %v2085_v51 = vpack.c.bf16 %v1437_v59, %v1437_v59  ;;  %v1351_v63 = vmul.f32 %v1342_v46, %v1239_v41  ;;  %v1344_v6 = vpop.permute.xlu1 %1343 }
 0x271   : > { %v2086_v54 = vpack.c.bf16 %v1438_v53, %v1438_v53  ;;  %v1352_v24 = vmul.f32 %v1344_v6, %v1240_v47 }
 0x272   : > { %1477 = vst [vmem:[%s3332_s14 + $0x24] sm:$0xf] %v2085_v51  ;;  %v1359_v55 = vadd.f32 %v1351_v63, %v1327_v11 }
 0x273   : > { %v1262_v26 = vpop.permute.xlu0 %1261  ;;  %1478 = vst [vmem:[%s3332_s14 + $0x2c] sm:$0xf] %v2086_v54  ;;  %v1360_v58 = vadd.f32 %v1352_v24, %v1328_v15 }
 0x274   : > { %v2079_v16 = vpack.c.bf16 %v1359_v55, %v1359_v55  ;;  %v1271_v3 = vmul.f32 %v1262_v26, %v1239_v41  ;;  %v1264_v43 = vpop.permute.xlu1 %1263 }
 0x275   : > { %v2080_v20 = vpack.c.bf16 %v1360_v58, %v1360_v58  ;;  %v1272_v29 = vmul.f32 %v1264_v43, %v1240_v47 }
 0x276   : > { %1399 = vst [vmem:[%s3327_s8 + $0x30] sm:$0xf] %v2079_v16  ;;  %v1279_v44 = vadd.f32 %v1271_v3, %v1247_v28 }
 0x277   : > { %v1502_v48 = vpop.permute.xlu0 %1501  ;;  %1400 = vst [vmem:[%s3327_s8 + $0x38] sm:$0xf] %v2080_v20  ;;  %v1280_v25 = vadd.f32 %v1272_v29, %v1248_v49 }
 0x278   : > { %v2071_v7 = vpack.c.bf16 %v1279_v44, %v1279_v44  ;;  %v1511_v30 = vmul.f32 %v1502_v48, %v1239_v41  ;;  %v1504_v27 = vpop.permute.xlu1 %1503 }
 0x279   : > { %v2072_v21 = vpack.c.bf16 %v1280_v25, %v1280_v25  ;;  %v1512_v32 = vmul.f32 %v1504_v27, %v1240_v47 }
 0x27a   : > { %1319 = vst [vmem:[%s3332_s14 + $0x30] sm:$0xf] %v2071_v7  ;;  %v1519_v31 = vadd.f32 %v1511_v30, %v1487_v17 }
 0x27b   : > { %v1422_v8 = vpop.permute.xlu0 %1421  ;;  %1320 = vst [vmem:[%s3332_s14 + $0x38] sm:$0xf] %v2072_v21  ;;  %v1520_v57 = vadd.f32 %v1512_v32, %v1488_v0 }
 0x27c   : > { %v2095_v33 = vpack.c.bf16 %v1519_v31, %v1519_v31  ;;  %v1431_v34 = vmul.f32 %v1422_v8, %v1239_v41  ;;  %v1424_v60 = vpop.permute.xlu1 %1423 }
 0x27d   : > { %v2096_v12 = vpack.c.bf16 %v1520_v57, %v1520_v57  ;;  %v1432_v50 = vmul.f32 %v1424_v60, %v1240_v47 }
 0x27e   : > { %1559 = vst [vmem:[%s3327_s8 + $0x34] sm:$0xf] %v2095_v33  ;;  %v1439_v61 = vadd.f32 %v1431_v34, %v1407_v18 }
 0x27f   : > { %1560 = vst [vmem:[%s3327_s8 + $0x3c] sm:$0xf] %v2096_v12  ;;  %v1440_v23 = vadd.f32 %v1432_v50, %v1408_v22  ;;  %s2554_s8 = scalar_lea.vmem %s2553_s6, 2048 }
 0x280   : > { %v2087_v19 = vpack.c.bf16 %v1439_v61, %v1439_v61  ;;  %p2556_p2 = scmp.lt.s32.totalorder %s2554_s8, %s2548_s9 }
 0x282   : > { %p2557_p12 = por %p2556_p2, %p2555_p13 }
 0x284   : > { %p2558_p6 = pnand %p2557_p12, %p2551_p0 }
 0x286   : > { %2561 = shalt.err (!%p2558_p6)
}
 0x287   : > { %s2562_s17 = scalar_lea.hbm %s3411_s15, 1024  ;;  %s2566_s30 = scalar_lea.hbm %s3623_s19, 6144 }
 0x288   : > { %p2563_p5 = scmp.ne.s32.totalorder %s3411_s15, %s2562_s17  ;;  %p2567_p4 = scmp.lt.u32.totalorder %s3411_s15, %s3623_s19 }
 0x289   : > { %p2568_p1 = scmp.lt.u32.totalorder %s2566_s30, %s2562_s17  ;;  %p2570_p9 = scmp.lt.u32.totalorder %s2562_s17, %s3411_s15 }
 0x28a   : > { %p2564_p8 = pnand %p2563_p5, %p3628_p3 }
 0x28b   : > { %p2569_p10 = por %p2568_p1, %p2567_p4 }
 0x28c   : > { %p2565_p7 = pneg %p2564_p8 }
 0x28d   : > { %p2571_p11 = por %p2570_p9, %p2569_p10 }
 0x28f   : > { %p2572_p0 = pnand %p2571_p11, %p2565_p7 }
 0x291   : > { %2575 = shalt.err (!%p2572_p0)
}
 0x292   : > { %s2752_s9 = smov 128   ;;  %s2753_s5 = smov 8   ;;  %1479 = vst [vmem:[%s3332_s14 + $0x34] sm:$0xf] %v2087_v19  ;;  %v2088_v35 = vpack.c.bf16 %v1440_v23, %v1440_v23 }
 0x293   : > { %2155 = dma.vmem_to_hbm [thread:$0]  (%p3628_p3), %s3413_s12, 1024, %s3411_s15, %s3430_s18, %s2752_s9, %s2752_s9, %s2753_s5  }
 0x294   : > { %s2576_s6 = scalar_lea.vmem %s3400_s20, 1024  ;;  %s2754_s8 = smov [#allocation12]  }
 0x295   : > { %p2577_p13 = scmp.ne.s32.totalorder %s3400_s20, %s2576_s6  ;;  %s2580_s17 = sshll.u32 %s2754_s8, 4  ;;  %s2581_s17 = int_to_ptr.vmem [resolvable:$false] %s2580_s17 }
 0x296   : > { %s2582_s1 = scalar_lea.vmem %s2581_s17, 2048  ;;  %p2583_p6 = scmp.lt.s32.totalorder %s3400_s20, %s2581_s17 }
 0x297   : > { %p2578_p2 = pnand %p2577_p13, %p3628_p3  ;;  %p2584_p5 = scmp.lt.s32.totalorder %s2582_s1, %s2576_s6 }
 0x299   : > { %p2579_p12 = pneg %p2578_p2  ;;  %p2585_p8 = por %p2584_p5, %p2583_p6 }
 0x29b   : > { %p2586_p7 = pnand %p2585_p8, %p2579_p12 }
 0x29d   : > { %2589 = shalt.err (!%p2586_p7)
}
 0x29e   : > { %s2590_s12 = scalar_lea.hbm %s3418_s2, 1024  ;;  %s2594_s30 = scalar_lea.hbm %s3624_s13, 6144 }
 0x29f   : > { %p2591_p4 = scmp.ne.s32.totalorder %s3418_s2, %s2590_s12  ;;  %p2595_p9 = scmp.lt.u32.totalorder %s3418_s2, %s3624_s13 }
 0x2a0   : > { %p2596_p11 = scmp.lt.u32.totalorder %s2594_s30, %s2590_s12  ;;  %p2598_p13 = scmp.lt.u32.totalorder %s2590_s12, %s3418_s2 }
 0x2a1   : > { %p2592_p1 = pnand %p2591_p4, %p3628_p3 }
 0x2a2   : > { %p2597_p0 = por %p2596_p11, %p2595_p9 }
 0x2a3   : > { %p2593_p10 = pneg %p2592_p1 }
 0x2a4   : > { %p2599_p2 = por %p2598_p13, %p2597_p0 }
 0x2a6   : > { %p2600_p12 = pnand %p2599_p2, %p2593_p10 }
 0x2a8   : > { %2603 = shalt.err (!%p2600_p12)
}
 0x2a9   : > { %2156 = dma.vmem_to_hbm [thread:$0]  (%p3628_p3), %s3400_s20, 1024, %s3418_s2, %s3430_s18, %s2752_s9, %s2752_s9, %s2753_s5  }
 0x2aa   : > { %1480 = vst [vmem:[%s3332_s14 + $0x3c] sm:$0xf] %v2088_v35  ;;  %s1618_s6 = scalar_lea.sflag [#allocation4], %s3097_s16  ;;  %s2604_s8 = scalar_lea.vmem %s3426_s0, 1024 }
 0x2ab   : > { %p2605_p6 = scmp.ne.s32.totalorder %s3426_s0, %s2604_s8  ;;  %s2755_s17 = smov [#allocation9]  }
 0x2ac   : > { %s2608_s1 = sshll.u32 %s2755_s17, 4  ;;  %s2609_s1 = int_to_ptr.vmem [resolvable:$false] %s2608_s1 }
 0x2ad   : > { %p2606_p5 = pnand %p2605_p6, %p3628_p3  ;;  %s2610_s12 = scalar_lea.vmem %s2609_s1, 2048 }
 0x2ae   : > { %p2611_p7 = scmp.lt.s32.totalorder %s3426_s0, %s2609_s1  ;;  %p2612_p4 = scmp.lt.s32.totalorder %s2610_s12, %s2604_s8 }
 0x2af   : > { %p2607_p8 = pneg %p2606_p5 }
 0x2b0   : > { %p2613_p1 = por %p2612_p4, %p2611_p7 }
 0x2b2   : > { %p2614_p10 = pnand %p2613_p1, %p2607_p8 }
 0x2b4   : > { %2617 = shalt.err (!%p2614_p10)
}
 0x2b5   : > { %s2618_s14 = scalar_lea.hbm %s3424_s3, 1024  ;;  %s2622_s18 = scalar_lea.hbm %s3626_s10, 6144 }
 0x2b6   : > { %p2619_p9 = scmp.ne.s32.totalorder %s3424_s3, %s2618_s14  ;;  %p2623_p13 = scmp.lt.u32.totalorder %s3424_s3, %s3626_s10 }
 0x2b7   : > { %p2624_p2 = scmp.lt.u32.totalorder %s2622_s18, %s2618_s14  ;;  %p2626_p6 = scmp.lt.u32.totalorder %s2618_s14, %s3424_s3 }
 0x2b8   : > { %p2620_p11 = pnand %p2619_p9, %p3628_p3 }
 0x2b9   : > { %p2625_p12 = por %p2624_p2, %p2623_p13 }
 0x2ba   : > { %p2621_p0 = pneg %p2620_p11 }
 0x2bb   : > { %p2627_p5 = por %p2626_p6, %p2625_p12 }
 0x2bd   : > { %p2628_p8 = pnand %p2627_p5, %p2621_p0 }
 0x2bf   : > { %2631 = shalt.err (!%p2628_p8)
}
 0x2c0   : > { %2154 = dma.vmem_to_hbm [thread:$0]  (%p3628_p3), %s3426_s0, 1024, %s3424_s3, %s1618_s6, %s2752_s9, %s2752_s9, %s2753_s5  }
 0x2c1 PF: > { %p2187_p7 = scmp.ge.s32.totalorder %s2738_s7, 2  ;;  %s1697_s30 = sand.u32 1, %s2710_s24  }
 0x2c2   : > { %p3629_p4 = scmp.ne.s32.totalorder %s3606_s21, 0  ;;  %s1698_s28 = scalar_lea.sflag [#allocation4], %s1697_s30 }
 0x2c4   : > { %p2175_p1 = pnand %p2187_p7, %p3629_p4 }
 0x2c6   : > { %2689 = dma.done.wait (!%p2175_p1), %s1698_s28, 1024  }
 0x2c7   : > { %2691 = vsyncadd (!%p2175_p1), %s1698_s28, 4294966272  ;;  %s3630_s11 = sadd.s32 4294967294, %s2738_s7  }
 0x2c8   : > { %s1706_s4 = sand.u32 1, %s3630_s11  }
 0x2c9   : > { %s1707_s8 = scalar_lea.sflag [#allocation11], %s1706_s4 }
 0x2ca   : > { %2693 = dma.done.wait (!%p2175_p1), %s1707_s8, 2048  }
 0x2cb   : > { %2695 = vsyncadd (!%p2175_p1), %s1707_s8, 4294965248  ;;  %s27_s7 = sadd.s32 1, %s2738_s7   ;;  %s3631_s3 = sld [smem:[#allocation18_spill]] }
 0x2cc   : > { %p24_p3 = scmp.ge.s32.totalorder %s27_s7, 8   ;;  %s3632_s26 = sld [smem:[#allocation24_spill]] }
 0x2cd   : > { %s3633_s28 = sld [smem:[#allocation21_spill]]  ;;  %s3634_s16 = sld [smem:[#allocation22_spill]] }
 0x2ce   : > { %s3635_s30 = sld [smem:[#allocation23_spill]]  ;;  %s3636_s21 = smov %s2702_s22 }
 0x2cf   : > { %s3637_s22 = smov %s2706_s23  ;;  %s3638_s23 = smov %s2932_s27 }
 0x2d0   : > { %s3639_s24 = smov %s2714_s25  ;;  %s3641_s27 = smov %s2730_s29 }
 0x2d1   : > { %s3640_s25 = smov %s3631_s3  ;;  %26 = sbr.rel (!%p24_p3) target bundleno = 20 (0x14), region = 139 }
 0x2d3   : > { %s3642_s29 = smov %s3634_s16 }
 0x2d8   :  { %1721 = vsyncpa [#allocation3], 1 }
 0x2d9   :  { %1723 = vsyncpa [#allocation3 + $0x1], 1 }
 0x2da   :  { %1724 = vsyncpa [#allocation6], 1 }
 0x2db   :  { %1725 = vsyncpa [#allocation4], 1 }
 0x2dc   :  { %1727 = vsyncpa [#allocation4 + $0x1], 1 }
 0x2dd   :  { %1728 = vsyncpa [#allocation11], 1 }
 0x2de   :  { %1730 = vsyncpa [#allocation11 + $0x1], 1 }

</bundles_post_ra>
